<compile_context>
chip_gen: v7x
topology: tpu7x:2x2x1
jax: 0.10.0
libtpu: 0.0.40
codegen_flags: <defaults>
</compile_context>

<pallas_src>
import functools
import math

import jax
import jax.numpy as jnp
from jax.experimental import pallas as pl
from jax.experimental.pallas import tpu as pltpu

MXU_DTYPE = jnp.bfloat16


def _round_up(x, m):
    return (x + m - 1) // m * m


def _block_diag(w):
    """(nb, din_b, dout_b) group-linear weight -> block-diagonal (nb*din_b, nb*dout_b)."""
    nb, dinb, doutb = w.shape
    out = jnp.zeros((nb * dinb, nb * doutb), w.dtype)
    for n in range(nb):
        out = out.at[n * dinb:(n + 1) * dinb, n * doutb:(n + 1) * doutb].set(w[n])
    return out


def _vmem_limit_bytes():
    mib = 1024 * 1024
    try:
        cap = pltpu.get_tpu_info().vmem_capacity_bytes
    except Exception:
        return 48 * mib
    # Leave headroom for compiler scratch; caps correctly for v7x's 64 MiB VMEM.
    return int(min(96 * mib, max(32 * mib, 0.6 * cap)))


def _pick_row_tile(rows, row_tile):
    """Pick (tm, padded_rows) avoiding padding whenever possible."""
    if rows <= row_tile:
        if rows >= 1024 and rows % 16 == 0:
            return rows // 2, rows          # >=2 grid steps so both v7x TCs get work
        return rows, rows                   # block == full dim -> always legal
    start = row_tile - (row_tile % 8)
    for tm in range(start, 7, -8):          # multiple of 8 that divides rows
        if rows % tm == 0:
            return tm, rows
    return row_tile, _round_up(rows, row_tile)   # fallback: pad, extra rows discarded


# ----------------------------- Pallas kernel -------------------------------


def mech_comm_kernel(x_ref, wqkv_ref, bqkv_ref, wf_ref, bf_ref,
                     seg_ref, segT_ref, o_ref, *, n_blocks, block_dim):
    D = n_blocks * block_dim

    # Fused block-diagonal Q/K/V projection: one lane-dense bf16 MXU matmul,
    # f32 accumulation.  Attention scale is already folded into the Q columns.
    x = x_ref[...].astype(MXU_DTYPE)                            # (TM, D)
    qkv = jnp.dot(x, wqkv_ref[...], preferred_element_type=jnp.float32)
    qkv = qkv + bqkv_ref[...]                                   # (TM, 3D) f32

    q = qkv[:, 0 * D:1 * D]
    k = qkv[:, 1 * D:2 * D]
    v = qkv[:, 2 * D:3 * D]

    seg = seg_ref[...]                                          # (D, G) bf16 0/1
    segT = segT_ref[...]                                        # (G, D) bf16 0/1

    # For rotation r, every q-block n is paired with k/v-block (n - r) mod NB;
    # over r = 0..NB-1 that enumerates every (n, m) block pair exactly once,
    # and k and v use the SAME rotation so the pairing stays consistent.
    #
    # Phase 1: per-rotation scores (narrow (TM, G)) + running max.  Only the
    # narrow scores stay live; no full-width rolled copies are kept around.
    scores = []
    smax = None
    for r in range(n_blocks):
        k_r = k if r == 0 else pltpu.roll(k, shift=r * block_dim, axis=1)  # XLU
        s_r = jnp.dot((q * k_r).astype(MXU_DTYPE), seg,
                      preferred_element_type=jnp.float32)        # segment-sum on MXU
        scores.append(s_r)
        smax = s_r if smax is None else jnp.maximum(smax, s_r)

    denom = None
    for r in range(n_blocks):
        e_r = jnp.exp(scores[r] - smax)                          # f32 EUP
        denom = e_r if denom is None else denom + e_r
    inv = pl.reciprocal(denom, approx=True)                      # EUP, ~free

    # Phase 2: re-roll v and recompute exp (EUP slot is idle) while accumulating
    # the weighted value sum lane-dense.
    out = None
    for r in range(n_blocks):
        v_r = v if r == 0 else pltpu.roll(v, shift=r * block_dim, axis=1)
        p_r = (jnp.exp(scores[r] - smax) * inv).astype(MXU_DTYPE)  # (TM, G)
        p_full = jnp.dot(p_r, segT,
                         preferred_element_type=jnp.float32)       # broadcast over head_dim lanes
        term = p_full * v_r
        out = term if out is None else out + term                  # (TM, D) f32

    # Final block-diagonal group linear + single full-width lane-dense store.
    y = jnp.dot(out.astype(MXU_DTYPE), wf_ref[...],
                preferred_element_type=jnp.float32) + bf_ref[...]
    o_ref[...] = y.astype(o_ref.dtype)
    # NOTE: the PyTorch forward also computes score.mean(dim=2) and discards it
    # (dead code) -> intentionally not computed here.


# ------------------------------ wrappers -------------------------------------


def pack_mech_comm_params(params, n_blocks, n_heads, dim):
    """One-time weight packing (hoist out of the per-step forward)."""
    wq, bq, wk, bk, wv, bv, wf, bf = params
    block_dim = dim // n_blocks
    head_dim = block_dim // n_heads
    scale = head_dim ** (-0.5)
    G = n_blocks * n_heads
    f32 = jnp.float32

    # Block-diagonal (D, 3D) QKV weight (scale folded into Q), bf16 for the MXU.
    wqkv = jnp.concatenate(
        [_block_diag(wq) * scale, _block_diag(wk), _block_diag(wv)],
        axis=1).astype(MXU_DTYPE)
    bqkv = jnp.concatenate(
        [bq.reshape(-1) * scale, bk.reshape(-1), bv.reshape(-1)])[None, :].astype(f32)
    wf_bd = _block_diag(wf).astype(MXU_DTYPE)
    bf_row = bf.reshape(-1)[None, :].astype(f32)

    # 0/1 segment matrices: `seg` sums each (block, head) head_dim lane group,
    # `segT` broadcasts a per-(block, head) scalar back over its head_dim lanes.
    lane = jnp.arange(dim)
    group = (lane // block_dim) * n_heads + (lane % block_dim) // head_dim   # (D,)
    seg = (group[:, None] == jnp.arange(G)[None, :]).astype(MXU_DTYPE)       # (D, G)
    segT = seg.T                                                             # (G, D)
    return (wqkv, bqkv, wf_bd, bf_row, seg, segT)


def mechanism_communication(x, packed, n_blocks, *, row_tile=1024):
    wqkv, bqkv, wf_bd, bf_row, seg, segT = packed
    B, T, D = x.shape
    assert D % n_blocks == 0
    block_dim = D // n_blocks

    rows = B * T
    x2 = x.reshape(rows, D)                 # leading-dim merge only; no astype copy
    tm, rows_p = _pick_row_tile(rows, row_tile)
    if rows_p != rows:                      # fallback only; demo shapes never pad
        x2 = jnp.pad(x2, ((0, rows_p - rows), (0, 0)))

    kernel = functools.partial(mech_comm_kernel, n_blocks=n_blocks, block_dim=block_dim)

    def _call(single_buffer_weights):
        def const_spec(a):
            nd = a.ndim
            idx = lambda i, _nd=nd: (0,) * _nd
            if single_buffer_weights:
                # Constant-index blocks stay resident; no need to double-buffer.
                return pl.BlockSpec(a.shape, idx, pipeline_mode=pl.Buffered(1))
            return pl.BlockSpec(a.shape, idx)

        return pl.pallas_call(
            kernel,
            out_shape=jax.ShapeDtypeStruct((rows_p, D), x.dtype),
            grid=(rows_p // tm,),
            in_specs=[
                pl.BlockSpec((tm, D), lambda i: (i, 0)),
                const_spec(wqkv), const_spec(bqkv),
                const_spec(wf_bd), const_spec(bf_row),
                const_spec(seg), const_spec(segT),
            ],
            out_specs=pl.BlockSpec((tm, D), lambda i: (i, 0)),
            compiler_params=pltpu.CompilerParams(
                dimension_semantics=("parallel",),
                vmem_limit_bytes=_vmem_limit_bytes()),
        )(x2, wqkv, bqkv, wf_bd, bf_row, seg, segT)

    try:
        out2 = _call(True)
    except Exception:
        # Some jax versions may reject pipeline_mode / Buffered(1); fall back to
        # the default double-buffered specs (identical semantics).
        out2 = _call(False)

    return out2[:rows].reshape(B, T, D)


# ------------------------- pure-JAX reference --------------------------------


def reference(x, params, n_blocks, n_heads):
    wq, bq, wk, bk, wv, bv, wf, bf = params
    B, T, D = x.shape
    block_dim = D // n_blocks
    head_dim = block_dim // n_heads
    scale = head_dim ** (-0.5)

    def group_linear(inp, w, b):
        nb, dinb, doutb = w.shape
        xb = inp.reshape(B, T, nb, dinb)
        y = jnp.einsum('btnd,nde->btne', xb, w) + b
        return y.reshape(B, T, nb * doutb)

    q = group_linear(x, wq, bq).reshape(B, T, n_blocks, n_heads, head_dim)
    k = group_linear(x, wk, bk).reshape(B, T, n_blocks, n_heads, head_dim)
    v = group_linear(x, wv, bv).reshape(B, T, n_blocks, n_heads, head_dim)
    q = jnp.swapaxes(q, 2, 3) * scale
    k = jnp.swapaxes(k, 2, 3)
    v = jnp.swapaxes(v, 2, 3)
    score = jnp.einsum('bthnd,bthmd->bthnm', q, k)
    score = jax.nn.softmax(score, axis=-1)
    out = jnp.einsum('bthnm,bthmd->bthnd', score, v)
    out = jnp.swapaxes(out, 2, 3).reshape(B, T, n_blocks * n_heads * head_dim)
    return group_linear(out, wf, bf)


# ------------------------------- main ----------------------------------------


def init_group_linear(key, din, dout, nb):
    dinb, doutb = din // nb, dout // nb
    a = 1.0 / math.sqrt(doutb)
    kw, kb = jax.random.split(key)
    w = jax.random.uniform(kw, (nb, dinb, doutb), jnp.float32, -a, a)
    b = jax.random.uniform(kb, (nb, doutb), jnp.float32, -a, a)
    return w, b


if __name__ == "__main__":
    B, T, D = 2, 8, 128
    n_blocks, n_heads = 4, 2
    block_dim = D // n_blocks
    head_dim = block_dim // n_heads
    emb_dim = head_dim * n_heads * n_blocks   # == D by construction

    key = jax.random.PRNGKey(0)
    kx, kq, kk, kv, kf = jax.random.split(key, 5)
    x = jax.random.normal(kx, (B, T, D), jnp.float32)

    wq, bq = init_group_linear(kq, D, emb_dim, n_blocks)
    wk, bk = init_group_linear(kk, D, emb_dim, n_blocks)
    wv, bv = init_group_linear(kv, D, emb_dim, n_blocks)
    wf, bf = init_group_linear(kf, emb_dim, D, n_blocks)
    params = (wq, bq, wk, bk, wv, bv, wf, bf)

    # Pack the block-diagonal / segment weights ONCE (hoisted out of the forward).
    packed = pack_mech_comm_params(params, n_blocks, n_heads, D)

    out = mechanism_communication(x, packed, n_blocks)
    out = jax.block_until_ready(out)

    ref = reference(x, params, n_blocks, n_heads)
    assert out.shape == (B, T, D)
    # bf16 MXU operands + approx reciprocal (EUP vrcp) vs. the pure-f32 reference.
    err = float(jnp.max(jnp.abs(out - ref)))
    assert jnp.allclose(out, ref, atol=2e-2, rtol=2e-2), err

    print("KERNEL_OK")
</pallas_src>

<mosaic_0001>
module attributes {stable_mosaic.version = 11 : i64} {
  func.func @mech_comm_kernel(%arg0: i32, %arg1: memref<16x128xf32, #tpu.memory_space<vmem>>, %arg2: memref<128x384xbf16, #tpu.memory_space<vmem>>, %arg3: memref<1x384xf32, #tpu.memory_space<vmem>>, %arg4: memref<128x128xbf16, #tpu.memory_space<vmem>>, %arg5: memref<1x128xf32, #tpu.memory_space<vmem>>, %arg6: memref<128x8xbf16, #tpu.memory_space<vmem>>, %arg7: memref<8x128xbf16, #tpu.memory_space<vmem>>, %arg8: memref<16x128xf32, #tpu.memory_space<vmem>>) attributes {dimension_semantics = [#tpu.dimension_semantics<parallel>], iteration_bounds = array<i64: 1>, scalar_prefetch = 0 : i64, scratch_operands = 0 : i64, tpu.core_type = #tpu.core_type<tc>, window_params = [{transform_indices = @transform_0, window_bounds = array<i64: 16, 128>}, {pipeline_mode = #tpu.pipeline_mode<synchronous>, transform_indices = @transform_1, window_bounds = array<i64: 128, 384>}, {pipeline_mode = #tpu.pipeline_mode<synchronous>, transform_indices = @transform_2, window_bounds = array<i64: 1, 384>}, {pipeline_mode = #tpu.pipeline_mode<synchronous>, transform_indices = @transform_3, window_bounds = array<i64: 128, 128>}, {pipeline_mode = #tpu.pipeline_mode<synchronous>, transform_indices = @transform_4, window_bounds = array<i64: 1, 128>}, {pipeline_mode = #tpu.pipeline_mode<synchronous>, transform_indices = @transform_5, window_bounds = array<i64: 128, 8>}, {pipeline_mode = #tpu.pipeline_mode<synchronous>, transform_indices = @transform_6, window_bounds = array<i64: 8, 128>}, {transform_indices = @transform_7, window_bounds = array<i64: 16, 128>}]} {
    %c0 = arith.constant 0 : index
    %c0_0 = arith.constant 0 : index
    %0 = vector.load %arg1[%c0, %c0_0] : memref<16x128xf32, #tpu.memory_space<vmem>>, vector<16x128xf32>
    %1 = arith.truncf %0 : vector<16x128xf32> to vector<16x128xbf16>
    %c0_1 = arith.constant 0 : index
    %c0_2 = arith.constant 0 : index
    %2 = vector.load %arg2[%c0_1, %c0_2] : memref<128x384xbf16, #tpu.memory_space<vmem>>, vector<128x384xbf16>
    %cst = arith.constant dense<0.000000e+00> : vector<16x384xf32>
    %3 = tpu.matmul %1, %2, %cst {dimension_numbers = #tpu.dot_dimension_numbers<[1], [0], [0], [1], [0, 0, 1, 1], [], []>} : vector<16x128xbf16>, vector<128x384xbf16>, vector<16x384xf32> -> vector<16x384xf32>
    %c0_3 = arith.constant 0 : index
    %c0_4 = arith.constant 0 : index
    %4 = vector.load %arg3[%c0_3, %c0_4] : memref<1x384xf32, #tpu.memory_space<vmem>>, vector<1x384xf32>
    %5 = vector.broadcast %4 : vector<1x384xf32> to vector<16x384xf32>
    %6 = arith.addf %3, %5 : vector<16x384xf32>
    %7 = vector.extract_strided_slice %6 {offsets = [0, 0], sizes = [16, 128], strides = [1, 1]} : vector<16x384xf32> to vector<16x128xf32>
    %8 = vector.extract_strided_slice %6 {offsets = [0, 128], sizes = [16, 128], strides = [1, 1]} : vector<16x384xf32> to vector<16x128xf32>
    %9 = vector.extract_strided_slice %6 {offsets = [0, 256], sizes = [16, 128], strides = [1, 1]} : vector<16x384xf32> to vector<16x128xf32>
    %c0_5 = arith.constant 0 : index
    %c0_6 = arith.constant 0 : index
    %10 = vector.load %arg6[%c0_5, %c0_6] : memref<128x8xbf16, #tpu.memory_space<vmem>>, vector<128x8xbf16>
    %c0_7 = arith.constant 0 : index
    %c0_8 = arith.constant 0 : index
    %11 = vector.load %arg7[%c0_7, %c0_8] : memref<8x128xbf16, #tpu.memory_space<vmem>>, vector<8x128xbf16>
    %12 = arith.mulf %7, %8 : vector<16x128xf32>
    %13 = arith.truncf %12 : vector<16x128xf32> to vector<16x128xbf16>
    %cst_9 = arith.constant dense<0.000000e+00> : vector<16x8xf32>
    %14 = tpu.matmul %13, %10, %cst_9 {dimension_numbers = #tpu.dot_dimension_numbers<[1], [0], [0], [1], [0, 0, 1, 1], [], []>} : vector<16x128xbf16>, vector<128x8xbf16>, vector<16x8xf32> -> vector<16x8xf32>
    %c32_i32 = arith.constant 32 : i32
    %15 = tpu.dynamic_rotate %8 by %c32_i32 dim 1 : vector<16x128xf32>, i32 -> vector<16x128xf32>
    %16 = arith.mulf %7, %15 : vector<16x128xf32>
    %17 = arith.truncf %16 : vector<16x128xf32> to vector<16x128xbf16>
    %cst_10 = arith.constant dense<0.000000e+00> : vector<16x8xf32>
    %18 = tpu.matmul %17, %10, %cst_10 {dimension_numbers = #tpu.dot_dimension_numbers<[1], [0], [0], [1], [0, 0, 1, 1], [], []>} : vector<16x128xbf16>, vector<128x8xbf16>, vector<16x8xf32> -> vector<16x8xf32>
    %19 = arith.maximumf %14, %18 : vector<16x8xf32>
    %c64_i32 = arith.constant 64 : i32
    %20 = tpu.dynamic_rotate %8 by %c64_i32 dim 1 : vector<16x128xf32>, i32 -> vector<16x128xf32>
    %21 = arith.mulf %7, %20 : vector<16x128xf32>
    %22 = arith.truncf %21 : vector<16x128xf32> to vector<16x128xbf16>
    %cst_11 = arith.constant dense<0.000000e+00> : vector<16x8xf32>
    %23 = tpu.matmul %22, %10, %cst_11 {dimension_numbers = #tpu.dot_dimension_numbers<[1], [0], [0], [1], [0, 0, 1, 1], [], []>} : vector<16x128xbf16>, vector<128x8xbf16>, vector<16x8xf32> -> vector<16x8xf32>
    %24 = arith.maximumf %19, %23 : vector<16x8xf32>
    %c96_i32 = arith.constant 96 : i32
    %25 = tpu.dynamic_rotate %8 by %c96_i32 dim 1 : vector<16x128xf32>, i32 -> vector<16x128xf32>
    %26 = arith.mulf %7, %25 : vector<16x128xf32>
    %27 = arith.truncf %26 : vector<16x128xf32> to vector<16x128xbf16>
    %cst_12 = arith.constant dense<0.000000e+00> : vector<16x8xf32>
    %28 = tpu.matmul %27, %10, %cst_12 {dimension_numbers = #tpu.dot_dimension_numbers<[1], [0], [0], [1], [0, 0, 1, 1], [], []>} : vector<16x128xbf16>, vector<128x8xbf16>, vector<16x8xf32> -> vector<16x8xf32>
    %29 = arith.maximumf %24, %28 : vector<16x8xf32>
    %30 = arith.subf %14, %29 : vector<16x8xf32>
    %31 = math.exp %30 : vector<16x8xf32>
    %32 = arith.subf %18, %29 : vector<16x8xf32>
    %33 = math.exp %32 : vector<16x8xf32>
    %34 = arith.addf %31, %33 : vector<16x8xf32>
    %35 = arith.subf %23, %29 : vector<16x8xf32>
    %36 = math.exp %35 : vector<16x8xf32>
    %37 = arith.addf %34, %36 : vector<16x8xf32>
    %38 = arith.subf %28, %29 : vector<16x8xf32>
    %39 = math.exp %38 : vector<16x8xf32>
    %40 = arith.addf %37, %39 : vector<16x8xf32>
    %41 = tpu.reciprocal %40 {approx = true} : vector<16x8xf32> -> vector<16x8xf32>
    %42 = arith.subf %14, %29 : vector<16x8xf32>
    %43 = math.exp %42 : vector<16x8xf32>
    %44 = arith.mulf %43, %41 : vector<16x8xf32>
    %45 = arith.truncf %44 : vector<16x8xf32> to vector<16x8xbf16>
    %cst_13 = arith.constant dense<0.000000e+00> : vector<16x128xf32>
    %46 = tpu.matmul %45, %11, %cst_13 {dimension_numbers = #tpu.dot_dimension_numbers<[1], [0], [0], [1], [0, 0, 1, 1], [], []>} : vector<16x8xbf16>, vector<8x128xbf16>, vector<16x128xf32> -> vector<16x128xf32>
    %47 = arith.mulf %46, %9 : vector<16x128xf32>
    %c32_i32_14 = arith.constant 32 : i32
    %48 = tpu.dynamic_rotate %9 by %c32_i32_14 dim 1 : vector<16x128xf32>, i32 -> vector<16x128xf32>
    %49 = arith.subf %18, %29 : vector<16x8xf32>
    %50 = math.exp %49 : vector<16x8xf32>
    %51 = arith.mulf %50, %41 : vector<16x8xf32>
    %52 = arith.truncf %51 : vector<16x8xf32> to vector<16x8xbf16>
    %cst_15 = arith.constant dense<0.000000e+00> : vector<16x128xf32>
    %53 = tpu.matmul %52, %11, %cst_15 {dimension_numbers = #tpu.dot_dimension_numbers<[1], [0], [0], [1], [0, 0, 1, 1], [], []>} : vector<16x8xbf16>, vector<8x128xbf16>, vector<16x128xf32> -> vector<16x128xf32>
    %54 = arith.mulf %53, %48 : vector<16x128xf32>
    %55 = arith.addf %47, %54 : vector<16x128xf32>
    %c64_i32_16 = arith.constant 64 : i32
    %56 = tpu.dynamic_rotate %9 by %c64_i32_16 dim 1 : vector<16x128xf32>, i32 -> vector<16x128xf32>
    %57 = arith.subf %23, %29 : vector<16x8xf32>
    %58 = math.exp %57 : vector<16x8xf32>
    %59 = arith.mulf %58, %41 : vector<16x8xf32>
    %60 = arith.truncf %59 : vector<16x8xf32> to vector<16x8xbf16>
    %cst_17 = arith.constant dense<0.000000e+00> : vector<16x128xf32>
    %61 = tpu.matmul %60, %11, %cst_17 {dimension_numbers = #tpu.dot_dimension_numbers<[1], [0], [0], [1], [0, 0, 1, 1], [], []>} : vector<16x8xbf16>, vector<8x128xbf16>, vector<16x128xf32> -> vector<16x128xf32>
    %62 = arith.mulf %61, %56 : vector<16x128xf32>
    %63 = arith.addf %55, %62 : vector<16x128xf32>
    %c96_i32_18 = arith.constant 96 : i32
    %64 = tpu.dynamic_rotate %9 by %c96_i32_18 dim 1 : vector<16x128xf32>, i32 -> vector<16x128xf32>
    %65 = arith.subf %28, %29 : vector<16x8xf32>
    %66 = math.exp %65 : vector<16x8xf32>
    %67 = arith.mulf %66, %41 : vector<16x8xf32>
    %68 = arith.truncf %67 : vector<16x8xf32> to vector<16x8xbf16>
    %cst_19 = arith.constant dense<0.000000e+00> : vector<16x128xf32>
    %69 = tpu.matmul %68, %11, %cst_19 {dimension_numbers = #tpu.dot_dimension_numbers<[1], [0], [0], [1], [0, 0, 1, 1], [], []>} : vector<16x8xbf16>, vector<8x128xbf16>, vector<16x128xf32> -> vector<16x128xf32>
    %70 = arith.mulf %69, %64 : vector<16x128xf32>
    %71 = arith.addf %63, %70 : vector<16x128xf32>
    %72 = arith.truncf %71 : vector<16x128xf32> to vector<16x128xbf16>
    %c0_20 = arith.constant 0 : index
    %c0_21 = arith.constant 0 : index
    %73 = vector.load %arg4[%c0_20, %c0_21] : memref<128x128xbf16, #tpu.memory_space<vmem>>, vector<128x128xbf16>
    %cst_22 = arith.constant dense<0.000000e+00> : vector<16x128xf32>
    %74 = tpu.matmul %72, %73, %cst_22 {dimension_numbers = #tpu.dot_dimension_numbers<[1], [0], [0], [1], [0, 0, 1, 1], [], []>} : vector<16x128xbf16>, vector<128x128xbf16>, vector<16x128xf32> -> vector<16x128xf32>
    %c0_23 = arith.constant 0 : index
    %c0_24 = arith.constant 0 : index
    %75 = vector.load %arg5[%c0_23, %c0_24] : memref<1x128xf32, #tpu.memory_space<vmem>>, vector<1x128xf32>
    %76 = vector.broadcast %75 : vector<1x128xf32> to vector<16x128xf32>
    %77 = arith.addf %74, %76 : vector<16x128xf32>
    %c0_25 = arith.constant 0 : index
    %c0_26 = arith.constant 0 : index
    %78 = vector.load %arg8[%c0_25, %c0_26] : memref<16x128xf32, #tpu.memory_space<vmem>>, vector<16x128xf32>
    tpu.vector_store %arg8[%c0_25, %c0_26], %77 {strides = array<i32>} : memref<16x128xf32, #tpu.memory_space<vmem>>, vector<16x128xf32>,
    return
  }
  func.func @transform_0(%arg0: i32) -> (i32, i32) {
    %c0_i32 = arith.constant 0 : i32
    %c0_i32_0 = arith.constant 0 : i32
    return %arg0, %c0_i32 : i32, i32
  }
  func.func @transform_1(%arg0: i32) -> (i32, i32) {
    %c0_i32 = arith.constant 0 : i32
    %c0_i32_0 = arith.constant 0 : i32
    %c0_i32_1 = arith.constant 0 : i32
    return %c0_i32, %c0_i32_0 : i32, i32
  }
  func.func @transform_2(%arg0: i32) -> (i32, i32) {
    %c0_i32 = arith.constant 0 : i32
    %c0_i32_0 = arith.constant 0 : i32
    %c0_i32_1 = arith.constant 0 : i32
    return %c0_i32, %c0_i32_0 : i32, i32
  }
  func.func @transform_3(%arg0: i32) -> (i32, i32) {
    %c0_i32 = arith.constant 0 : i32
    %c0_i32_0 = arith.constant 0 : i32
    %c0_i32_1 = arith.constant 0 : i32
    return %c0_i32, %c0_i32_0 : i32, i32
  }
  func.func @transform_4(%arg0: i32) -> (i32, i32) {
    %c0_i32 = arith.constant 0 : i32
    %c0_i32_0 = arith.constant 0 : i32
    %c0_i32_1 = arith.constant 0 : i32
    return %c0_i32, %c0_i32_0 : i32, i32
  }
  func.func @transform_5(%arg0: i32) -> (i32, i32) {
    %c0_i32 = arith.constant 0 : i32
    %c0_i32_0 = arith.constant 0 : i32
    %c0_i32_1 = arith.constant 0 : i32
    return %c0_i32, %c0_i32_0 : i32, i32
  }
  func.func @transform_6(%arg0: i32) -> (i32, i32) {
    %c0_i32 = arith.constant 0 : i32
    %c0_i32_0 = arith.constant 0 : i32
    %c0_i32_1 = arith.constant 0 : i32
    return %c0_i32, %c0_i32_0 : i32, i32
  }
  func.func @transform_7(%arg0: i32) -> (i32, i32) {
    %c0_i32 = arith.constant 0 : i32
    %c0_i32_0 = arith.constant 0 : i32
    return %arg0, %c0_i32 : i32, i32
  }
}

module attributes {stable_mosaic.version = 11 : i64} {
  func.func @mech_comm_kernel(%arg0: i32, %arg1: memref<16x128xf32, #tpu.memory_space<vmem>>, %arg2: memref<128x384xbf16, #tpu.memory_space<vmem>>, %arg3: memref<1x384xf32, #tpu.memory_space<vmem>>, %arg4: memref<128x128xbf16, #tpu.memory_space<vmem>>, %arg5: memref<1x128xf32, #tpu.memory_space<vmem>>, %arg6: memref<128x8xbf16, #tpu.memory_space<vmem>>, %arg7: memref<8x128xbf16, #tpu.memory_space<vmem>>, %arg8: memref<16x128xf32, #tpu.memory_space<vmem>>) attributes {dimension_semantics = [#tpu.dimension_semantics<parallel>], iteration_bounds = array<i64: 1>, scalar_prefetch = 0 : i64, scratch_operands = 0 : i64, tpu.core_type = #tpu.core_type<tc>, window_params = [{transform_indices = @transform_0, window_bounds = array<i64: 16, 128>}, {pipeline_mode = #tpu.pipeline_mode<synchronous>, transform_indices = @transform_1, window_bounds = array<i64: 128, 384>}, {pipeline_mode = #tpu.pipeline_mode<synchronous>, transform_indices = @transform_2, window_bounds = array<i64: 1, 384>}, {pipeline_mode = #tpu.pipeline_mode<synchronous>, transform_indices = @transform_3, window_bounds = array<i64: 128, 128>}, {pipeline_mode = #tpu.pipeline_mode<synchronous>, transform_indices = @transform_4, window_bounds = array<i64: 1, 128>}, {pipeline_mode = #tpu.pipeline_mode<synchronous>, transform_indices = @transform_5, window_bounds = array<i64: 128, 8>}, {pipeline_mode = #tpu.pipeline_mode<synchronous>, transform_indices = @transform_6, window_bounds = array<i64: 8, 128>}, {transform_indices = @transform_7, window_bounds = array<i64: 16, 128>}]} {
    %c0 = arith.constant 0 : index
    %c0_0 = arith.constant 0 : index
    %0 = vector.load %arg1[%c0, %c0_0] : memref<16x128xf32, #tpu.memory_space<vmem>>, vector<16x128xf32>
    %1 = arith.truncf %0 : vector<16x128xf32> to vector<16x128xbf16>
    %c0_1 = arith.constant 0 : index
    %c0_2 = arith.constant 0 : index
    %2 = vector.load %arg2[%c0_1, %c0_2] : memref<128x384xbf16, #tpu.memory_space<vmem>>, vector<128x384xbf16>
    %cst = arith.constant dense<0.000000e+00> : vector<16x384xf32>
    %3 = tpu.matmul %1, %2, %cst {dimension_numbers = #tpu.dot_dimension_numbers<[1], [0], [0], [1], [0, 0, 1, 1], [], []>} : vector<16x128xbf16>, vector<128x384xbf16>, vector<16x384xf32> -> vector<16x384xf32>
    %c0_3 = arith.constant 0 : index
    %c0_4 = arith.constant 0 : index
    %4 = vector.load %arg3[%c0_3, %c0_4] : memref<1x384xf32, #tpu.memory_space<vmem>>, vector<1x384xf32>
    %5 = vector.broadcast %4 : vector<1x384xf32> to vector<16x384xf32>
    %6 = arith.addf %3, %5 : vector<16x384xf32>
    %7 = vector.extract_strided_slice %6 {offsets = [0, 0], sizes = [16, 128], strides = [1, 1]} : vector<16x384xf32> to vector<16x128xf32>
    %8 = vector.extract_strided_slice %6 {offsets = [0, 128], sizes = [16, 128], strides = [1, 1]} : vector<16x384xf32> to vector<16x128xf32>
    %9 = vector.extract_strided_slice %6 {offsets = [0, 256], sizes = [16, 128], strides = [1, 1]} : vector<16x384xf32> to vector<16x128xf32>
    %c0_5 = arith.constant 0 : index
    %c0_6 = arith.constant 0 : index
    %10 = vector.load %arg6[%c0_5, %c0_6] : memref<128x8xbf16, #tpu.memory_space<vmem>>, vector<128x8xbf16>
    %c0_7 = arith.constant 0 : index
    %c0_8 = arith.constant 0 : index
    %11 = vector.load %arg7[%c0_7, %c0_8] : memref<8x128xbf16, #tpu.memory_space<vmem>>, vector<8x128xbf16>
    %12 = arith.mulf %7, %8 : vector<16x128xf32>
    %13 = arith.truncf %12 : vector<16x128xf32> to vector<16x128xbf16>
    %cst_9 = arith.constant dense<0.000000e+00> : vector<16x8xf32>
    %14 = tpu.matmul %13, %10, %cst_9 {dimension_numbers = #tpu.dot_dimension_numbers<[1], [0], [0], [1], [0, 0, 1, 1], [], []>} : vector<16x128xbf16>, vector<128x8xbf16>, vector<16x8xf32> -> vector<16x8xf32>
    %c32_i32 = arith.constant 32 : i32
    %15 = tpu.dynamic_rotate %8 by %c32_i32 dim 1 : vector<16x128xf32>, i32 -> vector<16x128xf32>
    %16 = arith.mulf %7, %15 : vector<16x128xf32>
    %17 = arith.truncf %16 : vector<16x128xf32> to vector<16x128xbf16>
    %cst_10 = arith.constant dense<0.000000e+00> : vector<16x8xf32>
    %18 = tpu.matmul %17, %10, %cst_10 {dimension_numbers = #tpu.dot_dimension_numbers<[1], [0], [0], [1], [0, 0, 1, 1], [], []>} : vector<16x128xbf16>, vector<128x8xbf16>, vector<16x8xf32> -> vector<16x8xf32>
    %19 = arith.maximumf %14, %18 : vector<16x8xf32>
    %c64_i32 = arith.constant 64 : i32
    %20 = tpu.dynamic_rotate %8 by %c64_i32 dim 1 : vector<16x128xf32>, i32 -> vector<16x128xf32>
    %21 = arith.mulf %7, %20 : vector<16x128xf32>
    %22 = arith.truncf %21 : vector<16x128xf32> to vector<16x128xbf16>
    %cst_11 = arith.constant dense<0.000000e+00> : vector<16x8xf32>
    %23 = tpu.matmul %22, %10, %cst_11 {dimension_numbers = #tpu.dot_dimension_numbers<[1], [0], [0], [1], [0, 0, 1, 1], [], []>} : vector<16x128xbf16>, vector<128x8xbf16>, vector<16x8xf32> -> vector<16x8xf32>
    %24 = arith.maximumf %19, %23 : vector<16x8xf32>
    %c96_i32 = arith.constant 96 : i32
    %25 = tpu.dynamic_rotate %8 by %c96_i32 dim 1 : vector<16x128xf32>, i32 -> vector<16x128xf32>
    %26 = arith.mulf %7, %25 : vector<16x128xf32>
    %27 = arith.truncf %26 : vector<16x128xf32> to vector<16x128xbf16>
    %cst_12 = arith.constant dense<0.000000e+00> : vector<16x8xf32>
    %28 = tpu.matmul %27, %10, %cst_12 {dimension_numbers = #tpu.dot_dimension_numbers<[1], [0], [0], [1], [0, 0, 1, 1], [], []>} : vector<16x128xbf16>, vector<128x8xbf16>, vector<16x8xf32> -> vector<16x8xf32>
    %29 = arith.maximumf %24, %28 : vector<16x8xf32>
    %30 = arith.subf %14, %29 : vector<16x8xf32>
    %31 = math.exp %30 : vector<16x8xf32>
    %32 = arith.subf %18, %29 : vector<16x8xf32>
    %33 = math.exp %32 : vector<16x8xf32>
    %34 = arith.addf %31, %33 : vector<16x8xf32>
    %35 = arith.subf %23, %29 : vector<16x8xf32>
    %36 = math.exp %35 : vector<16x8xf32>
    %37 = arith.addf %34, %36 : vector<16x8xf32>
    %38 = arith.subf %28, %29 : vector<16x8xf32>
    %39 = math.exp %38 : vector<16x8xf32>
    %40 = arith.addf %37, %39 : vector<16x8xf32>
    %41 = tpu.reciprocal %40 {approx = true} : vector<16x8xf32> -> vector<16x8xf32>
    %42 = arith.subf %14, %29 : vector<16x8xf32>
    %43 = math.exp %42 : vector<16x8xf32>
    %44 = arith.mulf %43, %41 : vector<16x8xf32>
    %45 = arith.truncf %44 : vector<16x8xf32> to vector<16x8xbf16>
    %cst_13 = arith.constant dense<0.000000e+00> : vector<16x128xf32>
    %46 = tpu.matmul %45, %11, %cst_13 {dimension_numbers = #tpu.dot_dimension_numbers<[1], [0], [0], [1], [0, 0, 1, 1], [], []>} : vector<16x8xbf16>, vector<8x128xbf16>, vector<16x128xf32> -> vector<16x128xf32>
    %47 = arith.mulf %46, %9 : vector<16x128xf32>
    %c32_i32_14 = arith.constant 32 : i32
    %48 = tpu.dynamic_rotate %9 by %c32_i32_14 dim 1 : vector<16x128xf32>, i32 -> vector<16x128xf32>
    %49 = arith.subf %18, %29 : vector<16x8xf32>
    %50 = math.exp %49 : vector<16x8xf32>
    %51 = arith.mulf %50, %41 : vector<16x8xf32>
    %52 = arith.truncf %51 : vector<16x8xf32> to vector<16x8xbf16>
    %cst_15 = arith.constant dense<0.000000e+00> : vector<16x128xf32>
    %53 = tpu.matmul %52, %11, %cst_15 {dimension_numbers = #tpu.dot_dimension_numbers<[1], [0], [0], [1], [0, 0, 1, 1], [], []>} : vector<16x8xbf16>, vector<8x128xbf16>, vector<16x128xf32> -> vector<16x128xf32>
    %54 = arith.mulf %53, %48 : vector<16x128xf32>
    %55 = arith.addf %47, %54 : vector<16x128xf32>
    %c64_i32_16 = arith.constant 64 : i32
    %56 = tpu.dynamic_rotate %9 by %c64_i32_16 dim 1 : vector<16x128xf32>, i32 -> vector<16x128xf32>
    %57 = arith.subf %23, %29 : vector<16x8xf32>
    %58 = math.exp %57 : vector<16x8xf32>
    %59 = arith.mulf %58, %41 : vector<16x8xf32>
    %60 = arith.truncf %59 : vector<16x8xf32> to vector<16x8xbf16>
    %cst_17 = arith.constant dense<0.000000e+00> : vector<16x128xf32>
    %61 = tpu.matmul %60, %11, %cst_17 {dimension_numbers = #tpu.dot_dimension_numbers<[1], [0], [0], [1], [0, 0, 1, 1], [], []>} : vector<16x8xbf16>, vector<8x128xbf16>, vector<16x128xf32> -> vector<16x128xf32>
    %62 = arith.mulf %61, %56 : vector<16x128xf32>
    %63 = arith.addf %55, %62 : vector<16x128xf32>
    %c96_i32_18 = arith.constant 96 : i32
    %64 = tpu.dynamic_rotate %9 by %c96_i32_18 dim 1 : vector<16x128xf32>, i32 -> vector<16x128xf32>
    %65 = arith.subf %28, %29 : vector<16x8xf32>
    %66 = math.exp %65 : vector<16x8xf32>
    %67 = arith.mulf %66, %41 : vector<16x8xf32>
    %68 = arith.truncf %67 : vector<16x8xf32> to vector<16x8xbf16>
    %cst_19 = arith.constant dense<0.000000e+00> : vector<16x128xf32>
    %69 = tpu.matmul %68, %11, %cst_19 {dimension_numbers = #tpu.dot_dimension_numbers<[1], [0], [0], [1], [0, 0, 1, 1], [], []>} : vector<16x8xbf16>, vector<8x128xbf16>, vector<16x128xf32> -> vector<16x128xf32>
    %70 = arith.mulf %69, %64 : vector<16x128xf32>
    %71 = arith.addf %63, %70 : vector<16x128xf32>
    %72 = arith.truncf %71 : vector<16x128xf32> to vector<16x128xbf16>
    %c0_20 = arith.constant 0 : index
    %c0_21 = arith.constant 0 : index
    %73 = vector.load %arg4[%c0_20, %c0_21] : memref<128x128xbf16, #tpu.memory_space<vmem>>, vector<128x128xbf16>
    %cst_22 = arith.constant dense<0.000000e+00> : vector<16x128xf32>
    %74 = tpu.matmul %72, %73, %cst_22 {dimension_numbers = #tpu.dot_dimension_numbers<[1], [0], [0], [1], [0, 0, 1, 1], [], []>} : vector<16x128xbf16>, vector<128x128xbf16>, vector<16x128xf32> -> vector<16x128xf32>
    %c0_23 = arith.constant 0 : index
    %c0_24 = arith.constant 0 : index
    %75 = vector.load %arg5[%c0_23, %c0_24] : memref<1x128xf32, #tpu.memory_space<vmem>>, vector<1x128xf32>
    %76 = vector.broadcast %75 : vector<1x128xf32> to vector<16x128xf32>
    %77 = arith.addf %74, %76 : vector<16x128xf32>
    %c0_25 = arith.constant 0 : index
    %c0_26 = arith.constant 0 : index
    %78 = vector.load %arg8[%c0_25, %c0_26] : memref<16x128xf32, #tpu.memory_space<vmem>>, vector<16x128xf32>
    tpu.vector_store %arg8[%c0_25, %c0_26], %77 {strides = array<i32>} : memref<16x128xf32, #tpu.memory_space<vmem>>, vector<16x128xf32>,
    return
  }
  func.func @transform_0(%arg0: i32) -> (i32, i32) {
    %c0_i32 = arith.constant 0 : i32
    %c0_i32_0 = arith.constant 0 : i32
    return %arg0, %c0_i32 : i32, i32
  }
  func.func @transform_1(%arg0: i32) -> (i32, i32) {
    %c0_i32 = arith.constant 0 : i32
    %c0_i32_0 = arith.constant 0 : i32
    %c0_i32_1 = arith.constant 0 : i32
    return %c0_i32, %c0_i32_0 : i32, i32
  }
  func.func @transform_2(%arg0: i32) -> (i32, i32) {
    %c0_i32 = arith.constant 0 : i32
    %c0_i32_0 = arith.constant 0 : i32
    %c0_i32_1 = arith.constant 0 : i32
    return %c0_i32, %c0_i32_0 : i32, i32
  }
  func.func @transform_3(%arg0: i32) -> (i32, i32) {
    %c0_i32 = arith.constant 0 : i32
    %c0_i32_0 = arith.constant 0 : i32
    %c0_i32_1 = arith.constant 0 : i32
    return %c0_i32, %c0_i32_0 : i32, i32
  }
  func.func @transform_4(%arg0: i32) -> (i32, i32) {
    %c0_i32 = arith.constant 0 : i32
    %c0_i32_0 = arith.constant 0 : i32
    %c0_i32_1 = arith.constant 0 : i32
    return %c0_i32, %c0_i32_0 : i32, i32
  }
  func.func @transform_5(%arg0: i32) -> (i32, i32) {
    %c0_i32 = arith.constant 0 : i32
    %c0_i32_0 = arith.constant 0 : i32
    %c0_i32_1 = arith.constant 0 : i32
    return %c0_i32, %c0_i32_0 : i32, i32
  }
  func.func @transform_6(%arg0: i32) -> (i32, i32) {
    %c0_i32 = arith.constant 0 : i32
    %c0_i32_0 = arith.constant 0 : i32
    %c0_i32_1 = arith.constant 0 : i32
    return %c0_i32, %c0_i32_0 : i32, i32
  }
  func.func @transform_7(%arg0: i32) -> (i32, i32) {
    %c0_i32 = arith.constant 0 : i32
    %c0_i32_0 = arith.constant 0 : i32
    return %arg0, %c0_i32 : i32, i32
  }
}

</mosaic_0001>

<bundles_post_ra>
// kernel: tpu_custom_call.1
= control target key start
LH: loop header
LB: loop body
LE: loop exit
PB: predicated region body
PF: predicated region fallthrough
CT: control target
= control target key end

     0   :  { %12 = vsyncpa [#allocation3], 0  ;;  %s1685_s0 = inlined_call_operand.hbm [shape: f32[16,128], index: 0, kind: input, shape index: {}]   ;;  %s1686_s1 = inlined_call_operand.hbm [shape: bf16[128,384], index: 1, kind: input, shape index: {}]   ;;  %s1687_s2 = inlined_call_operand.vmem [shape: f32[1,384], index: 2, kind: input, shape index: {}]   ;;  %s1688_s3 = inlined_call_operand.vmem [shape: bf16[128,128], index: 3, kind: input, shape index: {}]   ;;  %s1689_s4 = inlined_call_operand.vmem [shape: f32[1,128], index: 4, kind: input, shape index: {}]   ;;  %s1690_s5 = inlined_call_operand.vmem [shape: bf16[128,8], index: 5, kind: input, shape index: {}]   ;;  %s1691_s6 = inlined_call_operand.vmem [shape: bf16[8,128], index: 6, kind: input, shape index: {}]   ;;  %s1692_s7 = inlined_call_operand.hbm [shape: f32[16,128], index: 7, kind: output, shape index: {}]  }
   0x1   :  { %13 = vsyncpa [#allocation6], 0 }
   0x2   :  { %14 = vsyncpa [#allocation4], 0  ;;  %s1367_s24 = smov [#allocation2]   ;;  %s1295_s28 = scalar_lea.hbm %s1685_s0, 256 }
   0x3   :  { %s20_s25 = sshll.u32 %s1367_s24, 4  ;;  %p1296_p0 = scmp.ne.s32.totalorder %s1685_s0, %s1295_s28  ;;  %s21_s25 = int_to_ptr.vmem [resolvable:$true] %s20_s25 }
   0x4   :  { %p1299_p1 = scmp.lt.u32.totalorder %s1295_s28, %s1685_s0 }
   0x6   :  { %p1301_p2 = pnand %p1299_p1, %p1296_p0 }
   0x8   :  { %1304 = shalt.err (!%p1301_p2)
}
   0x9   :  { %s1305_s10 = scalar_lea.vmem %s21_s25, 256  ;;  %p1310_p4 = scmp.lt.s32.totalorder %s21_s25, %s21_s25 }
   0xa   :  { %p1306_p3 = scmp.ne.s32.totalorder %s21_s25, %s1305_s10  ;;  %p1311_p5 = scmp.lt.s32.totalorder %s1305_s10, %s1305_s10 }
   0xc   :  { %p1312_p6 = por %p1311_p5, %p1310_p4 }
   0xe   :  { %p1313_p7 = pnand %p1312_p6, %p1306_p3 }
  0x10   :  { %1316 = shalt.err (!%p1313_p7)
}
  0x11   :  { %s1368_s11 = smov 128   ;;  %s1369_s12 = smov 8  }
  0x12   :  { %26 = dma.hbm_to_vmem [thread:$0]  %s1685_s0, 256, %s21_s25, [#allocation3], %s1368_s11, %s1368_s11, %s1369_s12  }
  0x13   :  { %s1370_s15 = smov [#allocation5]   ;;  %s1317_s19 = scalar_lea.hbm %s1686_s1, 3072 }
  0x14   :  { %s32_s16 = sshll.u32 %s1370_s15, 4  ;;  %p1318_p8 = scmp.ne.s32.totalorder %s1686_s1, %s1317_s19  ;;  %s33_s16 = int_to_ptr.vmem [resolvable:$true] %s32_s16 }
  0x15   :  { %p1321_p9 = scmp.lt.u32.totalorder %s1317_s19, %s1686_s1 }
  0x17   :  { %p1323_p10 = pnand %p1321_p9, %p1318_p8 }
  0x19   :  { %1326 = shalt.err (!%p1323_p10)
}
  0x1a   :  { %s1327_s24 = scalar_lea.vmem %s33_s16, 3072  ;;  %p1332_p12 = scmp.lt.s32.totalorder %s33_s16, %s33_s16 }
  0x1b   :  { %p1328_p11 = scmp.ne.s32.totalorder %s33_s16, %s1327_s24  ;;  %p1333_p13 = scmp.lt.s32.totalorder %s1327_s24, %s1327_s24 }
  0x1d   :  { %p1334_p0 = por %p1333_p13, %p1332_p12 }
  0x1f   :  { %p1335_p1 = pnand %p1334_p0, %p1328_p11 }
  0x21   :  { %1338 = shalt.err (!%p1335_p1)
}
  0x22   :  { %s1371_s0 = smov 192   ;;  %s1372_s25 = smov 12  }
  0x23   :  { %38 = dma.hbm_to_vmem [thread:$0]  %s1686_s1, 3072, %s33_s16, [#allocation6], %s1371_s0, %s1371_s0, %s1372_s25  }
  0x24   :  { %1361 = dma.done.wait [#allocation3], 256  }
  0x25   :  { %1362 = vsyncadd [#allocation3], 4294967040 }
  0x26   :  { %1363 = dma.done.wait [#allocation6], 3072  }
  0x27   :  { %1364 = vsyncadd [#allocation6], 4294964224  ;;  %v1373_v0 = vmov 0   ;;  %v1374_v1 = vmov 0.0   ;;  %v1227_v2 = vld [vmem:[#allocation5 + $0x4] ss:$12 sps:$4 sm:$0xff]   ;;  %v93_v37 = vlaneseq }
  0x28   :  { %268 = vmatprep.mubr.bf16.mxu0 %v1373_v0  ;;  %1070 = vmatprep.subr.bf16.mxu1 %v1374_v1  ;;  %v1229_v3 = vld [vmem:[#allocation5] ss:$12 sps:$4 sm:$0xff]   ;;  %v1230_v4 = vld [vmem:[#allocation5 + $0x1c] ss:$12 sps:$4 sm:$0xff]   ;;  %v1232_v5 = vld [vmem:[#allocation5 + $0x18] ss:$12 sps:$4 sm:$0xff]  }
  0x29   :  { %236 = vmatprep.subr.bf16.mxu0 %v1227_v2  ;;  %v1233_v6 = vld [vmem:[#allocation5 + $0x34] ss:$12 sps:$4 sm:$0xff]   ;;  %v1235_v7 = vld [vmem:[#allocation5 + $0x30] ss:$12 sps:$4 sm:$0xff]   ;;  %v1236_v8 = vld [vmem:[#allocation5 + $0x4c] ss:$12 sps:$4 sm:$0xff]  }
  0x2a   :  { %237 = vmatpush1.bf16.msra.mxu0 %v1229_v3  ;;  %v1238_v9 = vld [vmem:[#allocation5 + $0x48] ss:$12 sps:$4 sm:$0xff]   ;;  %v1239_v10 = vld [vmem:[#allocation5 + $0x64] ss:$12 sps:$4 sm:$0xff]   ;;  %v1241_v11 = vld [vmem:[#allocation5 + $0x60] ss:$12 sps:$4 sm:$0xff]  }
  0x2b   :  { %238 = vmatprep.subr.bf16.mxu0 %v1230_v4  ;;  %v1242_v12 = vld [vmem:[#allocation5 + $0x7c] ss:$12 sps:$4 sm:$0xff]   ;;  %v1244_v13 = vld [vmem:[#allocation5 + $0x78] ss:$12 sps:$4 sm:$0xff]   ;;  %v1245_v14 = vld [vmem:[#allocation5 + $0x94] ss:$12 sps:$4 sm:$0xff]  }
  0x2c   :  { %v1247_v15 = vld [vmem:[#allocation5 + $0x90] ss:$12 sps:$4 sm:$0xff]   ;;  %v1248_v16 = vld [vmem:[#allocation5 + $0xac] ss:$12 sps:$4 sm:$0xff]   ;;  %v1250_v17 = vld [vmem:[#allocation5 + $0xa8] ss:$12 sps:$4 sm:$0xff]  }
  0x2d   :  { %v56_v18 = vld [vmem:[#allocation2] sm:$0xff]  ;;  %v57_v19 = vld [vmem:[#allocation2 + $0x8] sm:$0xff]  ;;  %v1465_v23 = vld [vmem:[%s1690_s5 + $0x10] sm:$0xff]   ;;  %vm1375_vm0 = vmmov 0   ;;  %v94_v38 = vshrl.u32 %v93_v37, 7  ;;  %s1376_s23 = smov 64  }
  0x2e   :  { %239 = vmatpush1.bf16.msra.mxu0 %v1232_v5  ;;  %v58_v20 = vpack.c.bf16 %v57_v19, %v56_v18  ;;  %v1451_v21 = vld [vmem:[%s1690_s5] sm:$0xff]   ;;  %v1458_v22 = vld [vmem:[%s1690_s5 + $0x8] sm:$0xff]   ;;  %v1472_v24 = vld [vmem:[%s1690_s5 + $0x18] sm:$0xff]   ;;  %1086 = vmatprep.mubr.msk.bf16.mxu1 %vm1375_vm0, %v1374_v1  ;;  %s1377_s24 = smov 32   ;;  %vm618_vm1 = vcmask 1043456   ;;  %vm614_vm2 = vcmask 64512  }
  0x2f   :  { %240 = vmatprep.subr.bf16.mxu0 %v1233_v6  ;;  %v1479_v25 = vld [vmem:[%s1690_s5 + $0x20] sm:$0xff]   ;;  %v1486_v26 = vld [vmem:[%s1690_s5 + $0x28] sm:$0xff]   ;;  %v1494_v27 = vld [vmem:[%s1690_s5 + $0x30] sm:$0xff]   ;;  %v95_v39 = vsub.s32 0, %v94_v38  ;;  %v99_v40 = vsub.s32 1, %v94_v38  ;;  %v103_v57 = vsub.s32 2, %v94_v38 }
  0x30   :  { %v1501_v28 = vld [vmem:[%s1690_s5 + $0x38] sm:$0xff]   ;;  %v1261_v31 = vld [vmem:[#allocation5 + $0x38] ss:$12 sps:$4 sm:$0xff]   ;;  %v1262_v32 = vld [vmem:[#allocation5 + $0x50] ss:$12 sps:$4 sm:$0xff]   ;;  %s1379_s20 = smov [#allocation7]  }
  0x31   :  { %v1259_v29 = vld [vmem:[#allocation5 + $0x8] ss:$12 sps:$4 sm:$0xff]   ;;  %v1260_v30 = vld [vmem:[#allocation5 + $0x20] ss:$12 sps:$4 sm:$0xff]   ;;  %v1265_v35 = vld [vmem:[#allocation5 + $0x98] ss:$12 sps:$4 sm:$0xff]  }
  0x32   :  { %241 = vmatpush1.bf16.msra.mxu0 %v1235_v7  ;;  %1071 = vmatpush3.bf16.msra.mxu1 %v1259_v29  ;;  %v1263_v33 = vld [vmem:[#allocation5 + $0x68] ss:$12 sps:$4 sm:$0xff]   ;;  %v1264_v34 = vld [vmem:[#allocation5 + $0x80] ss:$12 sps:$4 sm:$0xff]   ;;  %v1266_v36 = vld [vmem:[#allocation5 + $0xb0] ss:$12 sps:$4 sm:$0xff]  }
  0x33   :  { %242 = vmatprep.subr.bf16.mxu0 %v1236_v8  ;;  %1072 = vmatprep.subr.bf16.mxu1 %v1374_v1  ;;  %v91_v41 = vld [vmem:[%s1687_s2] sm:$0x7]  ;;  %s1378_s2 = smov 96   ;;  %s950_s21 = sshll.u32 %s1379_s20, 4  ;;  %s951_s21 = int_to_ptr.vmem [resolvable:$true] %s950_s21 }
  0x34   :  { %v96_v42 = vrot.slane %v91_v41, %v95_v39  ;;  %v100_v43 = vrot.slane %v91_v41, %v99_v40  ;;  %v104_v3 = vrot.slane %v91_v41, %v103_v57  ;;  %v336_v19 = vld [vmem:[%s1691_s6] sm:$0xf]  ;;  %s1339_s5 = scalar_lea.vmem %s951_s21, 256  ;;  %p1344_p3 = scmp.lt.s32.totalorder %s951_s21, %s951_s21 }
  0x35   :  { %p1340_p2 = scmp.ne.s32.totalorder %s951_s21, %s1339_s5  ;;  %p1345_p4 = scmp.lt.s32.totalorder %s1339_s5, %s1339_s5 }
  0x36   :  { %243 = vmatpush1.bf16.msra.mxu0 %v1238_v9  ;;  %1073 = vmatpush3.bf16.msra.mxu1 %v1260_v30 }
  0x37   :  { %244 = vmatprep.subr.bf16.mxu0 %v1239_v10  ;;  %1074 = vmatprep.subr.bf16.mxu1 %v1374_v1  ;;  %p1346_p5 = por %p1345_p4, %p1344_p3 }
  0x39   :  { %p1347_p6 = pnand %p1346_p5, %p1340_p2 }
  0x3a   :  { %245 = vmatpush1.bf16.msra.mxu0 %v1241_v11  ;;  %1075 = vmatpush3.bf16.msra.mxu1 %v1261_v31 }
  0x3b   :  { %246 = vmatprep.subr.bf16.mxu0 %v1242_v12  ;;  %1076 = vmatprep.subr.bf16.mxu1 %v1374_v1 }
  0x3e   :  { %247 = vmatpush1.bf16.msra.mxu0 %v1244_v13  ;;  %1077 = vmatpush3.bf16.msra.mxu1 %v1262_v32 }
  0x3f   :  { %248 = vmatprep.subr.bf16.mxu0 %v1245_v14  ;;  %1078 = vmatprep.subr.bf16.mxu1 %v1374_v1 }
  0x42   :  { %249 = vmatpush1.bf16.msra.mxu0 %v1247_v15  ;;  %1079 = vmatpush3.bf16.msra.mxu1 %v1263_v33 }
  0x43   :  { %250 = vmatprep.subr.bf16.mxu0 %v1248_v16  ;;  %1080 = vmatprep.subr.bf16.mxu1 %v1374_v1 }
  0x46   :  { %251 = vmatpush1.bf16.msra.mxu0 %v1250_v17  ;;  %1081 = vmatpush3.bf16.msra.mxu1 %v1264_v34 }
  0x47   :  { %1090 = vmatprep.subr.bf16.mxu0 %v1374_v1  ;;  %1082 = vmatprep.subr.bf16.mxu1 %v1374_v1 }
  0x49   :  { %269 = vmatmul.mubr.bf16.vlgmr.msra.gmra.mrb[0].mxu0 %v58_v20 }
  0x4a   :  { %1091 = vmatpush3.bf16.msra.mxu0 %v1451_v21  ;;  %1106 = vmatprep.mubr.msk.bf16.mxu0 %vm1375_vm0, %v1374_v1 }
  0x4b   :  { %1092 = vmatprep.subr.bf16.mxu0 %v1374_v1  ;;  %1083 = vmatpush3.bf16.msra.mxu1 %v1265_v35 }
  0x4c   :  { %1084 = vmatprep.subr.bf16.mxu1 %v1374_v1 }
  0x4e   :  { %1093 = vmatpush3.bf16.msra.mxu0 %v1458_v22 }
  0x4f   :  { %1094 = vmatprep.subr.bf16.mxu0 %v1374_v1  ;;  %1085 = vmatpush3.bf16.msra.mxu1 %v1266_v36 }
  0x50   :  { %1110 = vmatprep.subr.bf16.mxu1 %v1374_v1 }
  0x52   :  { %1095 = vmatpush3.bf16.msra.mxu0 %v1465_v23  ;;  %1087 = vmatmul.mubr.bf16.vlgmr.msra.gmra.mrb[0].mxu1 %v58_v20  ;;  %v1615_v20 = vsel %vm618_vm1, %v336_v19, 0 }
  0x53   :  { %1096 = vmatprep.subr.bf16.mxu0 %v1374_v1  ;;  %1111 = vmatpush3.bf16.msra.mxu1 %v1451_v21 }
  0x54   :  { %1126 = vmatprep.mubr.msk.bf16.mxu1 %vm1375_vm0, %v1374_v1  ;;  %1112 = vmatprep.subr.bf16.mxu1 %v1374_v1 }
  0x56   :  { %1097 = vmatpush3.bf16.msra.mxu0 %v1472_v24 }
  0x57   :  { %1098 = vmatprep.subr.bf16.mxu0 %v1374_v1  ;;  %1113 = vmatpush3.bf16.msra.mxu1 %v1458_v22 }
  0x58   :  { %1114 = vmatprep.subr.bf16.mxu1 %v1374_v1 }
  0x5a   :  { %1099 = vmatpush3.bf16.msra.mxu0 %v1479_v25 }
  0x5b   :  { %1100 = vmatprep.subr.bf16.mxu0 %v1374_v1  ;;  %1115 = vmatpush3.bf16.msra.mxu1 %v1465_v23 }
  0x5c   :  { %1116 = vmatprep.subr.bf16.mxu1 %v1374_v1 }
  0x5e   :  { %1101 = vmatpush3.bf16.msra.mxu0 %v1486_v26 }
  0x5f   :  { %1102 = vmatprep.subr.bf16.mxu0 %v1374_v1  ;;  %1117 = vmatpush3.bf16.msra.mxu1 %v1472_v24 }
  0x60   :  { %1118 = vmatprep.subr.bf16.mxu1 %v1374_v1 }
  0x62   :  { %1103 = vmatpush3.bf16.msra.mxu0 %v1494_v27 }
  0x63   :  { %1104 = vmatprep.subr.bf16.mxu0 %v1374_v1  ;;  %1119 = vmatpush3.bf16.msra.mxu1 %v1479_v25 }
  0x64   :  { %1120 = vmatprep.subr.bf16.mxu1 %v1374_v1 }
  0x66   :  { %1105 = vmatpush3.bf16.msra.mxu0 %v1501_v28 }
  0x67   :  { %1130 = vmatprep.subr.bf16.mxu0 %v1374_v1  ;;  %1121 = vmatpush3.bf16.msra.mxu1 %v1486_v26 }
  0x68   :  { %1122 = vmatprep.subr.bf16.mxu1 %v1374_v1 }
  0x6b   :  { %1123 = vmatpush3.bf16.msra.mxu1 %v1494_v27 }
  0x6c   :  { %1124 = vmatprep.subr.bf16.mxu1 %v1374_v1 }
  0x6f   :  { %1125 = vmatpush3.bf16.msra.mxu1 %v1501_v28 }
  0x70   :  { %1150 = vmatprep.subr.bf16.mxu1 %v1374_v1 }
 0x11c   :  { %v270_v44 = vpop.f32.mrb[0].mxu0 }
 0x11d   :  { %v272_v45 = vpop.f32.mrb[1].mxu0  ;;  %v1538_v46 = vadd.f32 %v270_v44, %v96_v42 }
 0x11e   :  { %v273_v47 = vadd.f32 %v272_v45, %v100_v43  ;;  %v274_v48 = vpop.f32.mrb[2].mxu0 }
 0x11f   :  { %v1540_v49 = vadd.f32 %v274_v48, %v96_v42  ;;  %v276_v50 = vpop.f32.mrb[3].mxu0 }
 0x120   :  { %v277_v51 = vadd.f32 %v276_v50, %v100_v43  ;;  %479 = vrot.lane.b32.xlu1 %v273_v47, %s1376_s23  ;;  %429 = vrot.lane.b32.xlu0 %v273_v47, %s1377_s24  ;;  %v337_v52 = vmul.f32 %v273_v47, %v1538_v46 }
 0x122   :  { %v338_v53 = vmul.f32 %v277_v51, %v1540_v49 }
 0x124   :  { %481 = vrot.lane.b32.xlu1 %v277_v51, %s1376_s23  ;;  %431 = vrot.lane.b32.xlu0 %v277_v51, %s1377_s24  ;;  %v339_v54 = vpack.c.bf16 %v338_v53, %v337_v52 }
 0x125   :  { %v313_v4 = vpop.f32.mrb[0].mxu1 }
 0x126   :  { %1107 = vmatmul.mubr.bf16.vlgmr.msra.gmra.mrb[4].mxu0 %v339_v54  ;;  %v1576_v5 = vadd.f32 %v313_v4, %v104_v3  ;;  %v1088_v6 = vpop.f32.mrb[1].mxu1 }
 0x127   :  { %1131 = vmatpush3.bf16.msra.mxu0 %v1451_v21  ;;  %1146 = vmatprep.mubr.msk.bf16.mxu0 %vm1375_vm0, %v1374_v1  ;;  %v316_v7 = vpop.f32.mrb[2].mxu1 }
 0x128   :  { %531 = vrot.lane.b32.xlu1 %v277_v51, %s1378_s2  ;;  %529 = vrot.lane.b32.xlu0 %v273_v47, %s1378_s2  ;;  %v1580_v8 = vadd.f32 %v316_v7, %v104_v3  ;;  %v1089_v9 = vpop.f32.mrb[3].mxu1 }
 0x129   :  { %1132 = vmatprep.subr.bf16.mxu0 %v1374_v1 }
 0x12b   :  { %1133 = vmatpush3.bf16.msra.mxu0 %v1458_v22 }
 0x12c   :  { %1134 = vmatprep.subr.bf16.mxu0 %v1374_v1  ;;  %665 = vrot.lane.b32.xlu0 %v1576_v5, %s1377_s24 }
 0x12d   :  { %667 = vrot.lane.b32.xlu1 %v1580_v8, %s1377_s24 }
 0x12f   :  { %1135 = vmatpush3.bf16.msra.mxu0 %v1465_v23 }
 0x130   :  { %1136 = vmatprep.subr.bf16.mxu0 %v1374_v1  ;;  %720 = vrot.lane.b32.xlu0 %v1576_v5, %s1376_s23 }
 0x131   :  { %722 = vrot.lane.b32.xlu1 %v1580_v8, %s1376_s23 }
 0x133   :  { %1137 = vmatpush3.bf16.msra.mxu0 %v1472_v24 }
 0x134   :  { %1138 = vmatprep.subr.bf16.mxu0 %v1374_v1  ;;  %775 = vrot.lane.b32.xlu0 %v1576_v5, %s1378_s2 }
 0x135   :  { %777 = vrot.lane.b32.xlu1 %v1580_v8, %s1378_s2 }
 0x137   :  { %1139 = vmatpush3.bf16.msra.mxu0 %v1479_v25 }
 0x138   :  { %1140 = vmatprep.subr.bf16.mxu0 %v1374_v1 }
 0x13b   :  { %1141 = vmatpush3.bf16.msra.mxu0 %v1486_v26 }
 0x13c   :  { %1142 = vmatprep.subr.bf16.mxu0 %v1374_v1 }
 0x13f   :  { %1143 = vmatpush3.bf16.msra.mxu0 %v1494_v27 }
 0x140   :  { %1144 = vmatprep.subr.bf16.mxu0 %v1374_v1 }
 0x143   :  { %1145 = vmatpush3.bf16.msra.mxu0 %v1501_v28 }
 0x144   :  { %1194 = vmatprep.subr.bf16.mxu0 %v1374_v1 }
 0x192   :  { %v480_v55 = vpop.permute.xlu1 %479  ;;  %v430_v56 = vpop.permute.xlu0 %429 }
 0x193   :  { %v483_v60 = vmul.f32 %v480_v55, %v1538_v46  ;;  %v433_v61 = vmul.f32 %v430_v56, %v1538_v46 }
 0x196   :  { %v482_v58 = vpop.permute.xlu1 %481  ;;  %v432_v59 = vpop.permute.xlu0 %431 }
 0x197   :  { %v484_v62 = vmul.f32 %v482_v58, %v1540_v49  ;;  %v434_v63 = vmul.f32 %v432_v59, %v1540_v49 }
 0x199   :  { %v485_v0 = vpack.c.bf16 %v484_v62, %v483_v60  ;;  %v435_v2 = vpack.c.bf16 %v434_v63, %v433_v61 }
 0x19a   :  { %v532_v10 = vpop.permute.xlu1 %531  ;;  %v530_v11 = vpop.permute.xlu0 %529 }
 0x19b   :  { %1127 = vmatmul.mubr.bf16.vlgmr.msra.gmra.mrb[4].mxu1 %v435_v2  ;;  %1147 = vmatmul.mubr.bf16.vlgmr.msra.gmra.mrb[8].mxu0 %v485_v0  ;;  %v534_v12 = vmul.f32 %v532_v10, %v1540_v49  ;;  %v533_v13 = vmul.f32 %v530_v11, %v1538_v46 }
 0x19c   :  { %1151 = vmatpush3.bf16.msra.mxu1 %v1451_v21  ;;  %1166 = vmatprep.mubr.msk.bf16.mxu1 %vm1375_vm0, %v1374_v1 }
 0x19d   :  { %1152 = vmatprep.subr.bf16.mxu1 %v1374_v1  ;;  %1210 = vmatprep.mubr.msk.bf16.mxu0 %vm1375_vm0, %v1374_v1  ;;  %v535_v14 = vpack.c.bf16 %v534_v12, %v533_v13 }
 0x1a0   :  { %1153 = vmatpush3.bf16.msra.mxu1 %v1458_v22 }
 0x1a1   :  { %1154 = vmatprep.subr.bf16.mxu1 %v1374_v1 }
 0x1a4   :  { %1155 = vmatpush3.bf16.msra.mxu1 %v1465_v23 }
 0x1a5   :  { %1156 = vmatprep.subr.bf16.mxu1 %v1374_v1 }
 0x1a8   :  { %1157 = vmatpush3.bf16.msra.mxu1 %v1472_v24 }
 0x1a9   :  { %1158 = vmatprep.subr.bf16.mxu1 %v1374_v1 }
 0x1ac   :  { %1159 = vmatpush3.bf16.msra.mxu1 %v1479_v25 }
 0x1ad   :  { %1160 = vmatprep.subr.bf16.mxu1 %v1374_v1 }
 0x1b0   :  { %1161 = vmatpush3.bf16.msra.mxu1 %v1486_v26 }
 0x1b1   :  { %1162 = vmatprep.subr.bf16.mxu1 %v1374_v1 }
 0x1b4   :  { %1163 = vmatpush3.bf16.msra.mxu1 %v1494_v27 }
 0x1b5   :  { %1164 = vmatprep.subr.bf16.mxu1 %v1374_v1 }
 0x1b8   :  { %1165 = vmatpush3.bf16.msra.mxu1 %v1501_v28 }
 0x1b9   :  { %1170 = vmatprep.subr.bf16.mxu1 %v1374_v1 }
 0x1bb   :  { %1167 = vmatmul.mubr.bf16.vlgmr.msra.gmra.mrb[8].mxu1 %v535_v14 }
 0x1bc   :  { %1172 = vmatprep.mubr.msk.bf16.mxu1 %vm1375_vm0, %v1374_v1  ;;  %1171 = vmatpush3.bf16.msra.mxu1 %v1615_v20 }
 0x1bd   :  { %1176 = vmatprep.subr.bf16.mxu1 %v1374_v1 }
 0x1f9   :  { %v422_v15 = vpop.f32.mrb[4].mxu0 }
 0x1fa   :  { %v1108_v16 = vpop.f32.mrb[5].mxu0 }
 0x1fb   :  { %v425_v17 = vpop.f32.mrb[6].mxu0 }
 0x1fc   :  { %v1109_v18 = vpop.f32.mrb[7].mxu0 }
 0x26e   :  { %v470_v21 = vpop.f32.mrb[4].mxu1  ;;  %v520_v22 = vpop.f32.mrb[8].mxu0 }
 0x26f   :  { %v477_v23 = vmax.f32 %v422_v15, %v470_v21  ;;  %v1128_v24 = vpop.f32.mrb[5].mxu1  ;;  %v1148_v25 = vpop.f32.mrb[9].mxu0 }
 0x270   :  { %v473_v26 = vpop.f32.mrb[6].mxu1  ;;  %v523_v27 = vpop.f32.mrb[10].mxu0  ;;  %v1268_v24 = vld [vmem:[%s1688_s3 + $0x8] sm:$0xff]   ;;  %v1270_v25 = vld [vmem:[%s1688_s3 + $0x18] sm:$0xff]  }
 0x271   :  { %v527_v28 = vmax.f32 %v477_v23, %v520_v22  ;;  %v478_v29 = vmax.f32 %v425_v17, %v473_v26  ;;  %v1129_v30 = vpop.f32.mrb[7].mxu1  ;;  %v1149_v31 = vpop.f32.mrb[11].mxu0  ;;  %v1267_v23 = vld [vmem:[%s1688_s3] sm:$0xff]  }
 0x272   :  { %1195 = vmatpush3.bf16.msra.mxu0 %v1267_v23 }
 0x273   :  { %v528_v32 = vmax.f32 %v478_v29, %v523_v27  ;;  %1196 = vmatprep.subr.bf16.mxu0 %v1374_v1  ;;  %v1274_v29 = vld [vmem:[%s1688_s3 + $0x38] sm:$0xff]  }
 0x276   :  { %1197 = vmatpush3.bf16.msra.mxu0 %v1268_v24 }
 0x277   :  { %1198 = vmatprep.subr.bf16.mxu0 %v1374_v1 }
 0x28e   :  { %v570_v33 = vpop.f32.mrb[8].mxu1 }
 0x28f   :  { %v577_v34 = vmax.f32 %v527_v28, %v570_v33  ;;  %v1168_v35 = vpop.f32.mrb[9].mxu1  ;;  %v1273_v28 = vld [vmem:[%s1688_s3 + $0x30] sm:$0xff]  }
 0x290   :  { %v573_v36 = vpop.f32.mrb[10].mxu1 }
 0x291   :  { %v579_v37 = vsub.f32 %v422_v15, %v577_v34  ;;  %v585_v38 = vsub.f32 %v470_v21, %v577_v34  ;;  %v593_v39 = vsub.f32 %v520_v22, %v577_v34  ;;  %v601_v40 = vsub.f32 %v570_v33, %v577_v34  ;;  %v1169_v41 = vpop.f32.mrb[11].mxu1  ;;  %v666_v34 = vpop.permute.xlu0 %665 }
 0x292   :  { %v578_v42 = vmax.f32 %v528_v32, %v573_v36 }
 0x293   :  { %v581_v43 = vmul.f32 1.442695, %v579_v37  ;;  %v587_v44 = vmul.f32 1.442695, %v585_v38  ;;  %v595_v45 = vmul.f32 1.442695, %v593_v39  ;;  %v668_v39 = vpop.permute.xlu1 %667 }
 0x294   :  { %v603_v46 = vmul.f32 1.442695, %v601_v40  ;;  %v580_v47 = vsub.f32 %v425_v17, %v578_v42  ;;  %v586_v48 = vsub.f32 %v473_v26, %v578_v42  ;;  %v594_v49 = vsub.f32 %v523_v27, %v578_v42  ;;  %v1271_v26 = vld [vmem:[%s1688_s3 + $0x20] sm:$0xff]   ;;  %v1272_v27 = vld [vmem:[%s1688_s3 + $0x28] sm:$0xff]  }
 0x295   :  { %1275 = vpow2.f32 %v581_v43  ;;  %v602_v50 = vsub.f32 %v573_v36, %v578_v42 }
 0x296   :  { %1277 = vpow2.f32 %v587_v44  ;;  %v583_v51 = vmul.f32 1.442695, %v580_v47  ;;  %v589_v52 = vmul.f32 1.442695, %v586_v48  ;;  %v597_v53 = vmul.f32 1.442695, %v594_v49 }
 0x297   :  { %1279 = vpow2.f32 %v595_v45  ;;  %v605_v54 = vmul.f32 1.442695, %v602_v50  ;;  %v721_v45 = vpop.permute.xlu0 %720  ;;  %v723_v49 = vpop.permute.xlu1 %722 }
 0x298   :  { %1281 = vpow2.f32 %v603_v46 }
 0x299   :  { %1283 = vpow2.f32 %v583_v51 }
 0x29a   :  { %1285 = vpow2.f32 %v589_v52 }
 0x29b   :  { %1287 = vpow2.f32 %v597_v53 }
 0x29c   :  { %1289 = vpow2.f32 %v605_v54  ;;  %v776_v54 = vpop.permute.xlu0 %775 }
 0x29f   :  { %v1276_v55 = vpop.eup %1275 }
 0x2a0   :  { %v1278_v56 = vpop.eup %1277 }
 0x2a1   :  { %v1280_v57 = vpop.eup %1279  ;;  %v591_v58 = vadd.f32 %v1278_v56, %v1276_v55 }
 0x2a2   :  { %v1282_v59 = vpop.eup %1281 }
 0x2a3   :  { %v1284_v60 = vpop.eup %1283  ;;  %v599_v61 = vadd.f32 %v1280_v57, %v591_v58  ;;  %v778_v58 = vpop.permute.xlu1 %777 }
 0x2a4   :  { %v1286_v62 = vpop.eup %1285 }
 0x2a5   :  { %v607_v63 = vadd.f32 %v1282_v59, %v599_v61  ;;  %v592_v0 = vadd.f32 %v1286_v62, %v1284_v60  ;;  %v1288_v2 = vpop.eup %1287 }
 0x2a6   :  { %v1290_v4 = vpop.eup %1289 }
 0x2a7   :  { %1291 = vrcp.f32 %v607_v63  ;;  %v600_v3 = vadd.f32 %v1288_v2, %v592_v0  ;;  %v999_v0 = vld [vmem:[%s1689_s4] ss:$0 sm:$0xff] }
 0x2a9   :  { %v608_v6 = vadd.f32 %v1290_v4, %v600_v3 }
 0x2ab   :  { %1293 = vrcp.f32 %v608_v6 }
 0x2b1   :  { %v1292_v7 = vpop.eup %1291 }
 0x2b2   :  { %v779_v9 = vmul.f32 %v1292_v7, %v1282_v59  ;;  %v611_v10 = vmul.f32 %v1292_v7, %v1276_v55  ;;  %v669_v11 = vmul.f32 %v1292_v7, %v1278_v56  ;;  %v724_v12 = vmul.f32 %v1292_v7, %v1280_v57 }
 0x2b5   :  { %v1294_v13 = vpop.eup %1293 }
 0x2b6   :  { %v780_v14 = vmul.f32 %v1294_v13, %v1290_v4  ;;  %v612_v15 = vmul.f32 %v1294_v13, %v1284_v60  ;;  %v670_v16 = vmul.f32 %v1294_v13, %v1286_v62  ;;  %v725_v17 = vmul.f32 %v1294_v13, %v1288_v2 }
 0x2b8   :  { %v613_v18 = vpack.c.bf16 %v612_v15, %v611_v10  ;;  %v671_v19 = vpack.c.bf16 %v670_v16, %v669_v11  ;;  %v726_v21 = vpack.c.bf16 %v725_v17, %v724_v12  ;;  %v781_v22 = vpack.c.bf16 %v780_v14, %v779_v9 }
 0x2ba   :  { %1173 = vmatmul.mubr.msk.bf16.vlgmr.msra.gmra.mrb[12].mxu1 %vm614_vm2, %v613_v18 }
 0x2bb   :  { %1177 = vmatpush3.bf16.msra.mxu1 %v1615_v20  ;;  %1178 = vmatprep.mubr.msk.bf16.mxu1 %vm1375_vm0, %v1374_v1 }
 0x2bc   :  { %1182 = vmatprep.subr.bf16.mxu1 %v1374_v1 }
 0x2c2   :  { %1179 = vmatmul.mubr.msk.bf16.vlgmr.msra.gmra.mrb[16].mxu1 %vm614_vm2, %v671_v19 }
 0x2c3   :  { %1183 = vmatpush3.bf16.msra.mxu1 %v1615_v20  ;;  %1184 = vmatprep.mubr.msk.bf16.mxu1 %vm1375_vm0, %v1374_v1 }
 0x2c4   :  { %1188 = vmatprep.subr.bf16.mxu1 %v1374_v1 }
 0x2ca   :  { %1185 = vmatmul.mubr.msk.bf16.vlgmr.msra.gmra.mrb[20].mxu1 %vm614_vm2, %v726_v21 }
 0x2cb   :  { %1189 = vmatpush3.bf16.msra.mxu1 %v1615_v20  ;;  %1190 = vmatprep.mubr.msk.bf16.mxu1 %vm1375_vm0, %v1374_v1  ;;  %v1269_v20 = vld [vmem:[%s1688_s3 + $0x10] sm:$0xff]  }
 0x2cc   :  { %1199 = vmatpush3.bf16.msra.mxu0 %v1269_v20 }
 0x2cd   :  { %1200 = vmatprep.subr.bf16.mxu0 %v1374_v1 }
 0x2d0   :  { %1201 = vmatpush3.bf16.msra.mxu0 %v1270_v25 }
 0x2d1   :  { %1202 = vmatprep.subr.bf16.mxu0 %v1374_v1 }
 0x2d2   :  { %1191 = vmatmul.mubr.msk.bf16.vlgmr.msra.gmra.mrb[24].mxu1 %vm614_vm2, %v781_v22 }
 0x2d4   :  { %1203 = vmatpush3.bf16.msra.mxu0 %v1271_v26 }
 0x2d5   :  { %1204 = vmatprep.subr.bf16.mxu0 %v1374_v1 }
 0x2d8   :  { %1205 = vmatpush3.bf16.msra.mxu0 %v1272_v27 }
 0x2d9   :  { %1206 = vmatprep.subr.bf16.mxu0 %v1374_v1 }
 0x2dc   :  { %1207 = vmatpush3.bf16.msra.mxu0 %v1273_v28 }
 0x2dd   :  { %1208 = vmatprep.subr.bf16.mxu0 %v1374_v1 }
 0x2e0   :  { %1209 = vmatpush3.bf16.msra.mxu0 %v1274_v29 }
 0x38d   :  { %v656_v30 = vpop.f32.mrb[12].mxu1 }
 0x38e   :  { %v1174_v31 = vpop.f32.mrb[13].mxu1  ;;  %v663_v36 = vmul.f32 %v656_v30, %v1576_v5 }
 0x38f   :  { %v659_v32 = vpop.f32.mrb[14].mxu1 }
 0x390   :  { %v1175_v33 = vpop.f32.mrb[15].mxu1  ;;  %v664_v41 = vmul.f32 %v659_v32, %v1580_v8 }
 0x395   :  { %v709_v35 = vpop.f32.mrb[16].mxu1 }
 0x396   :  { %v716_v37 = vmul.f32 %v709_v35, %v666_v34  ;;  %v1180_v38 = vpop.f32.mrb[17].mxu1 }
 0x397   :  { %v712_v40 = vpop.f32.mrb[18].mxu1 }
 0x398   :  { %v718_v1 = vadd.f32 %v716_v37, %v663_v36  ;;  %v717_v42 = vmul.f32 %v712_v40, %v668_v39  ;;  %v1181_v43 = vpop.f32.mrb[19].mxu1 }
 0x39a   :  { %v719_v44 = vadd.f32 %v717_v42, %v664_v41 }
 0x39d   :  { %v764_v46 = vpop.f32.mrb[20].mxu1 }
 0x39e   :  { %v771_v47 = vmul.f32 %v764_v46, %v721_v45  ;;  %v1186_v48 = vpop.f32.mrb[21].mxu1 }
 0x39f   :  { %v767_v50 = vpop.f32.mrb[22].mxu1 }
 0x3a0   :  { %v773_v51 = vadd.f32 %v771_v47, %v718_v1  ;;  %v772_v52 = vmul.f32 %v767_v50, %v723_v49  ;;  %v1187_v53 = vpop.f32.mrb[23].mxu1 }
 0x3a2   :  { %v774_v5 = vadd.f32 %v772_v52, %v719_v44 }
 0x3a5   :  { %v819_v55 = vpop.f32.mrb[24].mxu1 }
 0x3a6   :  { %v826_v56 = vmul.f32 %v819_v55, %v776_v54  ;;  %v1192_v57 = vpop.f32.mrb[25].mxu1 }
 0x3a7   :  { %v822_v8 = vpop.f32.mrb[26].mxu1 }
 0x3a8   :  { %v828_v59 = vadd.f32 %v826_v56, %v773_v51  ;;  %v827_v60 = vmul.f32 %v822_v8, %v778_v58  ;;  %v1193_v61 = vpop.f32.mrb[27].mxu1 }
 0x3aa   :  { %v829_v62 = vadd.f32 %v827_v60, %v774_v5 }
 0x3ac   :  { %v830_v63 = vpack.c.bf16 %v829_v62, %v828_v59 }
 0x3ae   :  { %1211 = vmatmul.mubr.bf16.vlgmr.msra.gmra.mrb[12].mxu0 %v830_v63 }
 0x481   :  { %v936_v2 = vpop.f32.mrb[12].mxu0 }
 0x482   :  { %v937_v3 = vadd.f32 %v999_v0, %v936_v2  ;;  %v1212_v4 = vpop.f32.mrb[13].mxu0 }
 0x483   :  { %v939_v6 = vpop.f32.mrb[14].mxu0 }
 0x484   :  { %943 = vst [vmem:[#allocation7] sm:$0xff] %v937_v3  ;;  %v940_v7 = vadd.f32 %v999_v0, %v939_v6  ;;  %v1213_v9 = vpop.f32.mrb[15].mxu0 }
 0x486   :  { %944 = vst [vmem:[#allocation7 + $0x8] sm:$0xff] %v940_v7 }
 0x487   :  { %1350 = shalt.err (!%p1347_p6)
}
 0x488   :  { %s1351_s23 = scalar_lea.hbm %s1692_s7, 256 }
 0x489   :  { %p1352_p7 = scmp.ne.s32.totalorder %s1692_s7, %s1351_s23  ;;  %p1355_p8 = scmp.lt.u32.totalorder %s1351_s23, %s1692_s7 }
 0x48b   :  { %p1357_p9 = pnand %p1355_p8, %p1352_p7 }
 0x48d   :  { %1360 = shalt.err (!%p1357_p9)
}
 0x48e   :  { %956 = dma.vmem_to_hbm [thread:$0]  %s951_s21, 256, %s1692_s7, [#allocation4], %s1368_s11, %s1368_s11, %s1369_s12  }
 0x48f   :  { %1365 = dma.done.wait [#allocation4], 256  }
 0x490   :  { %1366 = vsyncadd [#allocation4], 4294967040 }
 0x491   :  { %960 = vsyncpa [#allocation3], 1 }
 0x492   :  { %961 = vsyncpa [#allocation6], 1 }
 0x493   :  { %962 = vsyncpa [#allocation4], 1 }

// kernel: tpu_custom_call.1
= control target key start
LH: loop header
LB: loop body
LE: loop exit
PB: predicated region body
PF: predicated region fallthrough
CT: control target
= control target key end

     0   :  { %12 = vsyncpa [#allocation3], 0  ;;  %s1685_s0 = inlined_call_operand.hbm [shape: f32[16,128], index: 0, kind: input, shape index: {}]   ;;  %s1686_s1 = inlined_call_operand.hbm [shape: bf16[128,384], index: 1, kind: input, shape index: {}]   ;;  %s1687_s2 = inlined_call_operand.vmem [shape: f32[1,384], index: 2, kind: input, shape index: {}]   ;;  %s1688_s3 = inlined_call_operand.vmem [shape: bf16[128,128], index: 3, kind: input, shape index: {}]   ;;  %s1689_s4 = inlined_call_operand.vmem [shape: f32[1,128], index: 4, kind: input, shape index: {}]   ;;  %s1690_s5 = inlined_call_operand.vmem [shape: bf16[128,8], index: 5, kind: input, shape index: {}]   ;;  %s1691_s6 = inlined_call_operand.vmem [shape: bf16[8,128], index: 6, kind: input, shape index: {}]   ;;  %s1692_s7 = inlined_call_operand.hbm [shape: f32[16,128], index: 7, kind: output, shape index: {}]  }
   0x1   :  { %13 = vsyncpa [#allocation6], 0 }
   0x2   :  { %14 = vsyncpa [#allocation4], 0  ;;  %s1367_s24 = smov [#allocation2]   ;;  %s1295_s28 = scalar_lea.hbm %s1685_s0, 256 }
   0x3   :  { %s20_s25 = sshll.u32 %s1367_s24, 4  ;;  %p1296_p0 = scmp.ne.s32.totalorder %s1685_s0, %s1295_s28  ;;  %s21_s25 = int_to_ptr.vmem [resolvable:$true] %s20_s25 }
   0x4   :  { %p1299_p1 = scmp.lt.u32.totalorder %s1295_s28, %s1685_s0 }
   0x6   :  { %p1301_p2 = pnand %p1299_p1, %p1296_p0 }
   0x8   :  { %1304 = shalt.err (!%p1301_p2)
}
   0x9   :  { %s1305_s10 = scalar_lea.vmem %s21_s25, 256  ;;  %p1310_p4 = scmp.lt.s32.totalorder %s21_s25, %s21_s25 }
   0xa   :  { %p1306_p3 = scmp.ne.s32.totalorder %s21_s25, %s1305_s10  ;;  %p1311_p5 = scmp.lt.s32.totalorder %s1305_s10, %s1305_s10 }
   0xc   :  { %p1312_p6 = por %p1311_p5, %p1310_p4 }
   0xe   :  { %p1313_p7 = pnand %p1312_p6, %p1306_p3 }
  0x10   :  { %1316 = shalt.err (!%p1313_p7)
}
  0x11   :  { %s1368_s11 = smov 128   ;;  %s1369_s12 = smov 8  }
  0x12   :  { %26 = dma.hbm_to_vmem [thread:$0]  %s1685_s0, 256, %s21_s25, [#allocation3], %s1368_s11, %s1368_s11, %s1369_s12  }
  0x13   :  { %s1370_s15 = smov [#allocation5]   ;;  %s1317_s19 = scalar_lea.hbm %s1686_s1, 3072 }
  0x14   :  { %s32_s16 = sshll.u32 %s1370_s15, 4  ;;  %p1318_p8 = scmp.ne.s32.totalorder %s1686_s1, %s1317_s19  ;;  %s33_s16 = int_to_ptr.vmem [resolvable:$true] %s32_s16 }
  0x15   :  { %p1321_p9 = scmp.lt.u32.totalorder %s1317_s19, %s1686_s1 }
  0x17   :  { %p1323_p10 = pnand %p1321_p9, %p1318_p8 }
  0x19   :  { %1326 = shalt.err (!%p1323_p10)
}
  0x1a   :  { %s1327_s24 = scalar_lea.vmem %s33_s16, 3072  ;;  %p1332_p12 = scmp.lt.s32.totalorder %s33_s16, %s33_s16 }
  0x1b   :  { %p1328_p11 = scmp.ne.s32.totalorder %s33_s16, %s1327_s24  ;;  %p1333_p13 = scmp.lt.s32.totalorder %s1327_s24, %s1327_s24 }
  0x1d   :  { %p1334_p0 = por %p1333_p13, %p1332_p12 }
  0x1f   :  { %p1335_p1 = pnand %p1334_p0, %p1328_p11 }
  0x21   :  { %1338 = shalt.err (!%p1335_p1)
}
  0x22   :  { %s1371_s0 = smov 192   ;;  %s1372_s25 = smov 12  }
  0x23   :  { %38 = dma.hbm_to_vmem [thread:$0]  %s1686_s1, 3072, %s33_s16, [#allocation6], %s1371_s0, %s1371_s0, %s1372_s25  }
  0x24   :  { %1361 = dma.done.wait [#allocation3], 256  }
  0x25   :  { %1362 = vsyncadd [#allocation3], 4294967040 }
  0x26   :  { %1363 = dma.done.wait [#allocation6], 3072  }
  0x27   :  { %1364 = vsyncadd [#allocation6], 4294964224  ;;  %v1373_v0 = vmov 0   ;;  %v1374_v1 = vmov 0.0   ;;  %v1227_v2 = vld [vmem:[#allocation5 + $0x4] ss:$12 sps:$4 sm:$0xff]   ;;  %v93_v37 = vlaneseq }
  0x28   :  { %268 = vmatprep.mubr.bf16.mxu0 %v1373_v0  ;;  %1070 = vmatprep.subr.bf16.mxu1 %v1374_v1  ;;  %v1229_v3 = vld [vmem:[#allocation5] ss:$12 sps:$4 sm:$0xff]   ;;  %v1230_v4 = vld [vmem:[#allocation5 + $0x1c] ss:$12 sps:$4 sm:$0xff]   ;;  %v1232_v5 = vld [vmem:[#allocation5 + $0x18] ss:$12 sps:$4 sm:$0xff]  }
  0x29   :  { %236 = vmatprep.subr.bf16.mxu0 %v1227_v2  ;;  %v1233_v6 = vld [vmem:[#allocation5 + $0x34] ss:$12 sps:$4 sm:$0xff]   ;;  %v1235_v7 = vld [vmem:[#allocation5 + $0x30] ss:$12 sps:$4 sm:$0xff]   ;;  %v1236_v8 = vld [vmem:[#allocation5 + $0x4c] ss:$12 sps:$4 sm:$0xff]  }
  0x2a   :  { %237 = vmatpush1.bf16.msra.mxu0 %v1229_v3  ;;  %v1238_v9 = vld [vmem:[#allocation5 + $0x48] ss:$12 sps:$4 sm:$0xff]   ;;  %v1239_v10 = vld [vmem:[#allocation5 + $0x64] ss:$12 sps:$4 sm:$0xff]   ;;  %v1241_v11 = vld [vmem:[#allocation5 + $0x60] ss:$12 sps:$4 sm:$0xff]  }
  0x2b   :  { %238 = vmatprep.subr.bf16.mxu0 %v1230_v4  ;;  %v1242_v12 = vld [vmem:[#allocation5 + $0x7c] ss:$12 sps:$4 sm:$0xff]   ;;  %v1244_v13 = vld [vmem:[#allocation5 + $0x78] ss:$12 sps:$4 sm:$0xff]   ;;  %v1245_v14 = vld [vmem:[#allocation5 + $0x94] ss:$12 sps:$4 sm:$0xff]  }
  0x2c   :  { %v1247_v15 = vld [vmem:[#allocation5 + $0x90] ss:$12 sps:$4 sm:$0xff]   ;;  %v1248_v16 = vld [vmem:[#allocation5 + $0xac] ss:$12 sps:$4 sm:$0xff]   ;;  %v1250_v17 = vld [vmem:[#allocation5 + $0xa8] ss:$12 sps:$4 sm:$0xff]  }
  0x2d   :  { %v56_v18 = vld [vmem:[#allocation2] sm:$0xff]  ;;  %v57_v19 = vld [vmem:[#allocation2 + $0x8] sm:$0xff]  ;;  %v1465_v23 = vld [vmem:[%s1690_s5 + $0x10] sm:$0xff]   ;;  %vm1375_vm0 = vmmov 0   ;;  %v94_v38 = vshrl.u32 %v93_v37, 7  ;;  %s1376_s23 = smov 64  }
  0x2e   :  { %239 = vmatpush1.bf16.msra.mxu0 %v1232_v5  ;;  %v58_v20 = vpack.c.bf16 %v57_v19, %v56_v18  ;;  %v1451_v21 = vld [vmem:[%s1690_s5] sm:$0xff]   ;;  %v1458_v22 = vld [vmem:[%s1690_s5 + $0x8] sm:$0xff]   ;;  %v1472_v24 = vld [vmem:[%s1690_s5 + $0x18] sm:$0xff]   ;;  %1086 = vmatprep.mubr.msk.bf16.mxu1 %vm1375_vm0, %v1374_v1  ;;  %s1377_s24 = smov 32   ;;  %vm618_vm1 = vcmask 1043456   ;;  %vm614_vm2 = vcmask 64512  }
  0x2f   :  { %240 = vmatprep.subr.bf16.mxu0 %v1233_v6  ;;  %v1479_v25 = vld [vmem:[%s1690_s5 + $0x20] sm:$0xff]   ;;  %v1486_v26 = vld [vmem:[%s1690_s5 + $0x28] sm:$0xff]   ;;  %v1494_v27 = vld [vmem:[%s1690_s5 + $0x30] sm:$0xff]   ;;  %v95_v39 = vsub.s32 0, %v94_v38  ;;  %v99_v40 = vsub.s32 1, %v94_v38  ;;  %v103_v57 = vsub.s32 2, %v94_v38 }
  0x30   :  { %v1501_v28 = vld [vmem:[%s1690_s5 + $0x38] sm:$0xff]   ;;  %v1261_v31 = vld [vmem:[#allocation5 + $0x38] ss:$12 sps:$4 sm:$0xff]   ;;  %v1262_v32 = vld [vmem:[#allocation5 + $0x50] ss:$12 sps:$4 sm:$0xff]   ;;  %s1379_s20 = smov [#allocation7]  }
  0x31   :  { %v1259_v29 = vld [vmem:[#allocation5 + $0x8] ss:$12 sps:$4 sm:$0xff]   ;;  %v1260_v30 = vld [vmem:[#allocation5 + $0x20] ss:$12 sps:$4 sm:$0xff]   ;;  %v1265_v35 = vld [vmem:[#allocation5 + $0x98] ss:$12 sps:$4 sm:$0xff]  }
  0x32   :  { %241 = vmatpush1.bf16.msra.mxu0 %v1235_v7  ;;  %1071 = vmatpush3.bf16.msra.mxu1 %v1259_v29  ;;  %v1263_v33 = vld [vmem:[#allocation5 + $0x68] ss:$12 sps:$4 sm:$0xff]   ;;  %v1264_v34 = vld [vmem:[#allocation5 + $0x80] ss:$12 sps:$4 sm:$0xff]   ;;  %v1266_v36 = vld [vmem:[#allocation5 + $0xb0] ss:$12 sps:$4 sm:$0xff]  }
  0x33   :  { %242 = vmatprep.subr.bf16.mxu0 %v1236_v8  ;;  %1072 = vmatprep.subr.bf16.mxu1 %v1374_v1  ;;  %v91_v41 = vld [vmem:[%s1687_s2] sm:$0x7]  ;;  %s1378_s2 = smov 96   ;;  %s950_s21 = sshll.u32 %s1379_s20, 4  ;;  %s951_s21 = int_to_ptr.vmem [resolvable:$true] %s950_s21 }
  0x34   :  { %v96_v42 = vrot.slane %v91_v41, %v95_v39  ;;  %v100_v43 = vrot.slane %v91_v41, %v99_v40  ;;  %v104_v3 = vrot.slane %v91_v41, %v103_v57  ;;  %v336_v19 = vld [vmem:[%s1691_s6] sm:$0xf]  ;;  %s1339_s5 = scalar_lea.vmem %s951_s21, 256  ;;  %p1344_p3 = scmp.lt.s32.totalorder %s951_s21, %s951_s21 }
  0x35   :  { %p1340_p2 = scmp.ne.s32.totalorder %s951_s21, %s1339_s5  ;;  %p1345_p4 = scmp.lt.s32.totalorder %s1339_s5, %s1339_s5 }
  0x36   :  { %243 = vmatpush1.bf16.msra.mxu0 %v1238_v9  ;;  %1073 = vmatpush3.bf16.msra.mxu1 %v1260_v30 }
  0x37   :  { %244 = vmatprep.subr.bf16.mxu0 %v1239_v10  ;;  %1074 = vmatprep.subr.bf16.mxu1 %v1374_v1  ;;  %p1346_p5 = por %p1345_p4, %p1344_p3 }
  0x39   :  { %p1347_p6 = pnand %p1346_p5, %p1340_p2 }
  0x3a   :  { %245 = vmatpush1.bf16.msra.mxu0 %v1241_v11  ;;  %1075 = vmatpush3.bf16.msra.mxu1 %v1261_v31 }
  0x3b   :  { %246 = vmatprep.subr.bf16.mxu0 %v1242_v12  ;;  %1076 = vmatprep.subr.bf16.mxu1 %v1374_v1 }
  0x3e   :  { %247 = vmatpush1.bf16.msra.mxu0 %v1244_v13  ;;  %1077 = vmatpush3.bf16.msra.mxu1 %v1262_v32 }
  0x3f   :  { %248 = vmatprep.subr.bf16.mxu0 %v1245_v14  ;;  %1078 = vmatprep.subr.bf16.mxu1 %v1374_v1 }
  0x42   :  { %249 = vmatpush1.bf16.msra.mxu0 %v1247_v15  ;;  %1079 = vmatpush3.bf16.msra.mxu1 %v1263_v33 }
  0x43   :  { %250 = vmatprep.subr.bf16.mxu0 %v1248_v16  ;;  %1080 = vmatprep.subr.bf16.mxu1 %v1374_v1 }
  0x46   :  { %251 = vmatpush1.bf16.msra.mxu0 %v1250_v17  ;;  %1081 = vmatpush3.bf16.msra.mxu1 %v1264_v34 }
  0x47   :  { %1090 = vmatprep.subr.bf16.mxu0 %v1374_v1  ;;  %1082 = vmatprep.subr.bf16.mxu1 %v1374_v1 }
  0x49   :  { %269 = vmatmul.mubr.bf16.vlgmr.msra.gmra.mrb[0].mxu0 %v58_v20 }
  0x4a   :  { %1091 = vmatpush3.bf16.msra.mxu0 %v1451_v21  ;;  %1106 = vmatprep.mubr.msk.bf16.mxu0 %vm1375_vm0, %v1374_v1 }
  0x4b   :  { %1092 = vmatprep.subr.bf16.mxu0 %v1374_v1  ;;  %1083 = vmatpush3.bf16.msra.mxu1 %v1265_v35 }
  0x4c   :  { %1084 = vmatprep.subr.bf16.mxu1 %v1374_v1 }
  0x4e   :  { %1093 = vmatpush3.bf16.msra.mxu0 %v1458_v22 }
  0x4f   :  { %1094 = vmatprep.subr.bf16.mxu0 %v1374_v1  ;;  %1085 = vmatpush3.bf16.msra.mxu1 %v1266_v36 }
  0x50   :  { %1110 = vmatprep.subr.bf16.mxu1 %v1374_v1 }
  0x52   :  { %1095 = vmatpush3.bf16.msra.mxu0 %v1465_v23  ;;  %1087 = vmatmul.mubr.bf16.vlgmr.msra.gmra.mrb[0].mxu1 %v58_v20  ;;  %v1615_v20 = vsel %vm618_vm1, %v336_v19, 0 }
  0x53   :  { %1096 = vmatprep.subr.bf16.mxu0 %v1374_v1  ;;  %1111 = vmatpush3.bf16.msra.mxu1 %v1451_v21 }
  0x54   :  { %1126 = vmatprep.mubr.msk.bf16.mxu1 %vm1375_vm0, %v1374_v1  ;;  %1112 = vmatprep.subr.bf16.mxu1 %v1374_v1 }
  0x56   :  { %1097 = vmatpush3.bf16.msra.mxu0 %v1472_v24 }
  0x57   :  { %1098 = vmatprep.subr.bf16.mxu0 %v1374_v1  ;;  %1113 = vmatpush3.bf16.msra.mxu1 %v1458_v22 }
  0x58   :  { %1114 = vmatprep.subr.bf16.mxu1 %v1374_v1 }
  0x5a   :  { %1099 = vmatpush3.bf16.msra.mxu0 %v1479_v25 }
  0x5b   :  { %1100 = vmatprep.subr.bf16.mxu0 %v1374_v1  ;;  %1115 = vmatpush3.bf16.msra.mxu1 %v1465_v23 }
  0x5c   :  { %1116 = vmatprep.subr.bf16.mxu1 %v1374_v1 }
  0x5e   :  { %1101 = vmatpush3.bf16.msra.mxu0 %v1486_v26 }
  0x5f   :  { %1102 = vmatprep.subr.bf16.mxu0 %v1374_v1  ;;  %1117 = vmatpush3.bf16.msra.mxu1 %v1472_v24 }
  0x60   :  { %1118 = vmatprep.subr.bf16.mxu1 %v1374_v1 }
  0x62   :  { %1103 = vmatpush3.bf16.msra.mxu0 %v1494_v27 }
  0x63   :  { %1104 = vmatprep.subr.bf16.mxu0 %v1374_v1  ;;  %1119 = vmatpush3.bf16.msra.mxu1 %v1479_v25 }
  0x64   :  { %1120 = vmatprep.subr.bf16.mxu1 %v1374_v1 }
  0x66   :  { %1105 = vmatpush3.bf16.msra.mxu0 %v1501_v28 }
  0x67   :  { %1130 = vmatprep.subr.bf16.mxu0 %v1374_v1  ;;  %1121 = vmatpush3.bf16.msra.mxu1 %v1486_v26 }
  0x68   :  { %1122 = vmatprep.subr.bf16.mxu1 %v1374_v1 }
  0x6b   :  { %1123 = vmatpush3.bf16.msra.mxu1 %v1494_v27 }
  0x6c   :  { %1124 = vmatprep.subr.bf16.mxu1 %v1374_v1 }
  0x6f   :  { %1125 = vmatpush3.bf16.msra.mxu1 %v1501_v28 }
  0x70   :  { %1150 = vmatprep.subr.bf16.mxu1 %v1374_v1 }
 0x11c   :  { %v270_v44 = vpop.f32.mrb[0].mxu0 }
 0x11d   :  { %v272_v45 = vpop.f32.mrb[1].mxu0  ;;  %v1538_v46 = vadd.f32 %v270_v44, %v96_v42 }
 0x11e   :  { %v273_v47 = vadd.f32 %v272_v45, %v100_v43  ;;  %v274_v48 = vpop.f32.mrb[2].mxu0 }
 0x11f   :  { %v1540_v49 = vadd.f32 %v274_v48, %v96_v42  ;;  %v276_v50 = vpop.f32.mrb[3].mxu0 }
 0x120   :  { %v277_v51 = vadd.f32 %v276_v50, %v100_v43  ;;  %479 = vrot.lane.b32.xlu1 %v273_v47, %s1376_s23  ;;  %429 = vrot.lane.b32.xlu0 %v273_v47, %s1377_s24  ;;  %v337_v52 = vmul.f32 %v273_v47, %v1538_v46 }
 0x122   :  { %v338_v53 = vmul.f32 %v277_v51, %v1540_v49 }
 0x124   :  { %481 = vrot.lane.b32.xlu1 %v277_v51, %s1376_s23  ;;  %431 = vrot.lane.b32.xlu0 %v277_v51, %s1377_s24  ;;  %v339_v54 = vpack.c.bf16 %v338_v53, %v337_v52 }
 0x125   :  { %v313_v4 = vpop.f32.mrb[0].mxu1 }
 0x126   :  { %1107 = vmatmul.mubr.bf16.vlgmr.msra.gmra.mrb[4].mxu0 %v339_v54  ;;  %v1576_v5 = vadd.f32 %v313_v4, %v104_v3  ;;  %v1088_v6 = vpop.f32.mrb[1].mxu1 }
 0x127   :  { %1131 = vmatpush3.bf16.msra.mxu0 %v1451_v21  ;;  %1146 = vmatprep.mubr.msk.bf16.mxu0 %vm1375_vm0, %v1374_v1  ;;  %v316_v7 = vpop.f32.mrb[2].mxu1 }
 0x128   :  { %531 = vrot.lane.b32.xlu1 %v277_v51, %s1378_s2  ;;  %529 = vrot.lane.b32.xlu0 %v273_v47, %s1378_s2  ;;  %v1580_v8 = vadd.f32 %v316_v7, %v104_v3  ;;  %v1089_v9 = vpop.f32.mrb[3].mxu1 }
 0x129   :  { %1132 = vmatprep.subr.bf16.mxu0 %v1374_v1 }
 0x12b   :  { %1133 = vmatpush3.bf16.msra.mxu0 %v1458_v22 }
 0x12c   :  { %1134 = vmatprep.subr.bf16.mxu0 %v1374_v1  ;;  %665 = vrot.lane.b32.xlu0 %v1576_v5, %s1377_s24 }
 0x12d   :  { %667 = vrot.lane.b32.xlu1 %v1580_v8, %s1377_s24 }
 0x12f   :  { %1135 = vmatpush3.bf16.msra.mxu0 %v1465_v23 }
 0x130   :  { %1136 = vmatprep.subr.bf16.mxu0 %v1374_v1  ;;  %720 = vrot.lane.b32.xlu0 %v1576_v5, %s1376_s23 }
 0x131   :  { %722 = vrot.lane.b32.xlu1 %v1580_v8, %s1376_s23 }
 0x133   :  { %1137 = vmatpush3.bf16.msra.mxu0 %v1472_v24 }
 0x134   :  { %1138 = vmatprep.subr.bf16.mxu0 %v1374_v1  ;;  %775 = vrot.lane.b32.xlu0 %v1576_v5, %s1378_s2 }
 0x135   :  { %777 = vrot.lane.b32.xlu1 %v1580_v8, %s1378_s2 }
 0x137   :  { %1139 = vmatpush3.bf16.msra.mxu0 %v1479_v25 }
 0x138   :  { %1140 = vmatprep.subr.bf16.mxu0 %v1374_v1 }
 0x13b   :  { %1141 = vmatpush3.bf16.msra.mxu0 %v1486_v26 }
 0x13c   :  { %1142 = vmatprep.subr.bf16.mxu0 %v1374_v1 }
 0x13f   :  { %1143 = vmatpush3.bf16.msra.mxu0 %v1494_v27 }
 0x140   :  { %1144 = vmatprep.subr.bf16.mxu0 %v1374_v1 }
 0x143   :  { %1145 = vmatpush3.bf16.msra.mxu0 %v1501_v28 }
 0x144   :  { %1194 = vmatprep.subr.bf16.mxu0 %v1374_v1 }
 0x192   :  { %v480_v55 = vpop.permute.xlu1 %479  ;;  %v430_v56 = vpop.permute.xlu0 %429 }
 0x193   :  { %v483_v60 = vmul.f32 %v480_v55, %v1538_v46  ;;  %v433_v61 = vmul.f32 %v430_v56, %v1538_v46 }
 0x196   :  { %v482_v58 = vpop.permute.xlu1 %481  ;;  %v432_v59 = vpop.permute.xlu0 %431 }
 0x197   :  { %v484_v62 = vmul.f32 %v482_v58, %v1540_v49  ;;  %v434_v63 = vmul.f32 %v432_v59, %v1540_v49 }
 0x199   :  { %v485_v0 = vpack.c.bf16 %v484_v62, %v483_v60  ;;  %v435_v2 = vpack.c.bf16 %v434_v63, %v433_v61 }
 0x19a   :  { %v532_v10 = vpop.permute.xlu1 %531  ;;  %v530_v11 = vpop.permute.xlu0 %529 }
 0x19b   :  { %1127 = vmatmul.mubr.bf16.vlgmr.msra.gmra.mrb[4].mxu1 %v435_v2  ;;  %1147 = vmatmul.mubr.bf16.vlgmr.msra.gmra.mrb[8].mxu0 %v485_v0  ;;  %v534_v12 = vmul.f32 %v532_v10, %v1540_v49  ;;  %v533_v13 = vmul.f32 %v530_v11, %v1538_v46 }
 0x19c   :  { %1151 = vmatpush3.bf16.msra.mxu1 %v1451_v21  ;;  %1166 = vmatprep.mubr.msk.bf16.mxu1 %vm1375_vm0, %v1374_v1 }
 0x19d   :  { %1152 = vmatprep.subr.bf16.mxu1 %v1374_v1  ;;  %1210 = vmatprep.mubr.msk.bf16.mxu0 %vm1375_vm0, %v1374_v1  ;;  %v535_v14 = vpack.c.bf16 %v534_v12, %v533_v13 }
 0x1a0   :  { %1153 = vmatpush3.bf16.msra.mxu1 %v1458_v22 }
 0x1a1   :  { %1154 = vmatprep.subr.bf16.mxu1 %v1374_v1 }
 0x1a4   :  { %1155 = vmatpush3.bf16.msra.mxu1 %v1465_v23 }
 0x1a5   :  { %1156 = vmatprep.subr.bf16.mxu1 %v1374_v1 }
 0x1a8   :  { %1157 = vmatpush3.bf16.msra.mxu1 %v1472_v24 }
 0x1a9   :  { %1158 = vmatprep.subr.bf16.mxu1 %v1374_v1 }
 0x1ac   :  { %1159 = vmatpush3.bf16.msra.mxu1 %v1479_v25 }
 0x1ad   :  { %1160 = vmatprep.subr.bf16.mxu1 %v1374_v1 }
 0x1b0   :  { %1161 = vmatpush3.bf16.msra.mxu1 %v1486_v26 }
 0x1b1   :  { %1162 = vmatprep.subr.bf16.mxu1 %v1374_v1 }
 0x1b4   :  { %1163 = vmatpush3.bf16.msra.mxu1 %v1494_v27 }
 0x1b5   :  { %1164 = vmatprep.subr.bf16.mxu1 %v1374_v1 }
 0x1b8   :  { %1165 = vmatpush3.bf16.msra.mxu1 %v1501_v28 }
 0x1b9   :  { %1170 = vmatprep.subr.bf16.mxu1 %v1374_v1 }
 0x1bb   :  { %1167 = vmatmul.mubr.bf16.vlgmr.msra.gmra.mrb[8].mxu1 %v535_v14 }
 0x1bc   :  { %1172 = vmatprep.mubr.msk.bf16.mxu1 %vm1375_vm0, %v1374_v1  ;;  %1171 = vmatpush3.bf16.msra.mxu1 %v1615_v20 }
 0x1bd   :  { %1176 = vmatprep.subr.bf16.mxu1 %v1374_v1 }
 0x1f9   :  { %v422_v15 = vpop.f32.mrb[4].mxu0 }
 0x1fa   :  { %v1108_v16 = vpop.f32.mrb[5].mxu0 }
 0x1fb   :  { %v425_v17 = vpop.f32.mrb[6].mxu0 }
 0x1fc   :  { %v1109_v18 = vpop.f32.mrb[7].mxu0 }
 0x26e   :  { %v470_v21 = vpop.f32.mrb[4].mxu1  ;;  %v520_v22 = vpop.f32.mrb[8].mxu0 }
 0x26f   :  { %v477_v23 = vmax.f32 %v422_v15, %v470_v21  ;;  %v1128_v24 = vpop.f32.mrb[5].mxu1  ;;  %v1148_v25 = vpop.f32.mrb[9].mxu0 }
 0x270   :  { %v473_v26 = vpop.f32.mrb[6].mxu1  ;;  %v523_v27 = vpop.f32.mrb[10].mxu0  ;;  %v1268_v24 = vld [vmem:[%s1688_s3 + $0x8] sm:$0xff]   ;;  %v1270_v25 = vld [vmem:[%s1688_s3 + $0x18] sm:$0xff]  }
 0x271   :  { %v527_v28 = vmax.f32 %v477_v23, %v520_v22  ;;  %v478_v29 = vmax.f32 %v425_v17, %v473_v26  ;;  %v1129_v30 = vpop.f32.mrb[7].mxu1  ;;  %v1149_v31 = vpop.f32.mrb[11].mxu0  ;;  %v1267_v23 = vld [vmem:[%s1688_s3] sm:$0xff]  }
 0x272   :  { %1195 = vmatpush3.bf16.msra.mxu0 %v1267_v23 }
 0x273   :  { %v528_v32 = vmax.f32 %v478_v29, %v523_v27  ;;  %1196 = vmatprep.subr.bf16.mxu0 %v1374_v1  ;;  %v1274_v29 = vld [vmem:[%s1688_s3 + $0x38] sm:$0xff]  }
 0x276   :  { %1197 = vmatpush3.bf16.msra.mxu0 %v1268_v24 }
 0x277   :  { %1198 = vmatprep.subr.bf16.mxu0 %v1374_v1 }
 0x28e   :  { %v570_v33 = vpop.f32.mrb[8].mxu1 }
 0x28f   :  { %v577_v34 = vmax.f32 %v527_v28, %v570_v33  ;;  %v1168_v35 = vpop.f32.mrb[9].mxu1  ;;  %v1273_v28 = vld [vmem:[%s1688_s3 + $0x30] sm:$0xff]  }
 0x290   :  { %v573_v36 = vpop.f32.mrb[10].mxu1 }
 0x291   :  { %v579_v37 = vsub.f32 %v422_v15, %v577_v34  ;;  %v585_v38 = vsub.f32 %v470_v21, %v577_v34  ;;  %v593_v39 = vsub.f32 %v520_v22, %v577_v34  ;;  %v601_v40 = vsub.f32 %v570_v33, %v577_v34  ;;  %v1169_v41 = vpop.f32.mrb[11].mxu1  ;;  %v666_v34 = vpop.permute.xlu0 %665 }
 0x292   :  { %v578_v42 = vmax.f32 %v528_v32, %v573_v36 }
 0x293   :  { %v581_v43 = vmul.f32 1.442695, %v579_v37  ;;  %v587_v44 = vmul.f32 1.442695, %v585_v38  ;;  %v595_v45 = vmul.f32 1.442695, %v593_v39  ;;  %v668_v39 = vpop.permute.xlu1 %667 }
 0x294   :  { %v603_v46 = vmul.f32 1.442695, %v601_v40  ;;  %v580_v47 = vsub.f32 %v425_v17, %v578_v42  ;;  %v586_v48 = vsub.f32 %v473_v26, %v578_v42  ;;  %v594_v49 = vsub.f32 %v523_v27, %v578_v42  ;;  %v1271_v26 = vld [vmem:[%s1688_s3 + $0x20] sm:$0xff]   ;;  %v1272_v27 = vld [vmem:[%s1688_s3 + $0x28] sm:$0xff]  }
 0x295   :  { %1275 = vpow2.f32 %v581_v43  ;;  %v602_v50 = vsub.f32 %v573_v36, %v578_v42 }
 0x296   :  { %1277 = vpow2.f32 %v587_v44  ;;  %v583_v51 = vmul.f32 1.442695, %v580_v47  ;;  %v589_v52 = vmul.f32 1.442695, %v586_v48  ;;  %v597_v53 = vmul.f32 1.442695, %v594_v49 }
 0x297   :  { %1279 = vpow2.f32 %v595_v45  ;;  %v605_v54 = vmul.f32 1.442695, %v602_v50  ;;  %v721_v45 = vpop.permute.xlu0 %720  ;;  %v723_v49 = vpop.permute.xlu1 %722 }
 0x298   :  { %1281 = vpow2.f32 %v603_v46 }
 0x299   :  { %1283 = vpow2.f32 %v583_v51 }
 0x29a   :  { %1285 = vpow2.f32 %v589_v52 }
 0x29b   :  { %1287 = vpow2.f32 %v597_v53 }
 0x29c   :  { %1289 = vpow2.f32 %v605_v54  ;;  %v776_v54 = vpop.permute.xlu0 %775 }
 0x29f   :  { %v1276_v55 = vpop.eup %1275 }
 0x2a0   :  { %v1278_v56 = vpop.eup %1277 }
 0x2a1   :  { %v1280_v57 = vpop.eup %1279  ;;  %v591_v58 = vadd.f32 %v1278_v56, %v1276_v55 }
 0x2a2   :  { %v1282_v59 = vpop.eup %1281 }
 0x2a3   :  { %v1284_v60 = vpop.eup %1283  ;;  %v599_v61 = vadd.f32 %v1280_v57, %v591_v58  ;;  %v778_v58 = vpop.permute.xlu1 %777 }
 0x2a4   :  { %v1286_v62 = vpop.eup %1285 }
 0x2a5   :  { %v607_v63 = vadd.f32 %v1282_v59, %v599_v61  ;;  %v592_v0 = vadd.f32 %v1286_v62, %v1284_v60  ;;  %v1288_v2 = vpop.eup %1287 }
 0x2a6   :  { %v1290_v4 = vpop.eup %1289 }
 0x2a7   :  { %1291 = vrcp.f32 %v607_v63  ;;  %v600_v3 = vadd.f32 %v1288_v2, %v592_v0  ;;  %v999_v0 = vld [vmem:[%s1689_s4] ss:$0 sm:$0xff] }
 0x2a9   :  { %v608_v6 = vadd.f32 %v1290_v4, %v600_v3 }
 0x2ab   :  { %1293 = vrcp.f32 %v608_v6 }
 0x2b1   :  { %v1292_v7 = vpop.eup %1291 }
 0x2b2   :  { %v779_v9 = vmul.f32 %v1292_v7, %v1282_v59  ;;  %v611_v10 = vmul.f32 %v1292_v7, %v1276_v55  ;;  %v669_v11 = vmul.f32 %v1292_v7, %v1278_v56  ;;  %v724_v12 = vmul.f32 %v1292_v7, %v1280_v57 }
 0x2b5   :  { %v1294_v13 = vpop.eup %1293 }
 0x2b6   :  { %v780_v14 = vmul.f32 %v1294_v13, %v1290_v4  ;;  %v612_v15 = vmul.f32 %v1294_v13, %v1284_v60  ;;  %v670_v16 = vmul.f32 %v1294_v13, %v1286_v62  ;;  %v725_v17 = vmul.f32 %v1294_v13, %v1288_v2 }
 0x2b8   :  { %v613_v18 = vpack.c.bf16 %v612_v15, %v611_v10  ;;  %v671_v19 = vpack.c.bf16 %v670_v16, %v669_v11  ;;  %v726_v21 = vpack.c.bf16 %v725_v17, %v724_v12  ;;  %v781_v22 = vpack.c.bf16 %v780_v14, %v779_v9 }
 0x2ba   :  { %1173 = vmatmul.mubr.msk.bf16.vlgmr.msra.gmra.mrb[12].mxu1 %vm614_vm2, %v613_v18 }
 0x2bb   :  { %1177 = vmatpush3.bf16.msra.mxu1 %v1615_v20  ;;  %1178 = vmatprep.mubr.msk.bf16.mxu1 %vm1375_vm0, %v1374_v1 }
 0x2bc   :  { %1182 = vmatprep.subr.bf16.mxu1 %v1374_v1 }
 0x2c2   :  { %1179 = vmatmul.mubr.msk.bf16.vlgmr.msra.gmra.mrb[16].mxu1 %vm614_vm2, %v671_v19 }
 0x2c3   :  { %1183 = vmatpush3.bf16.msra.mxu1 %v1615_v20  ;;  %1184 = vmatprep.mubr.msk.bf16.mxu1 %vm1375_vm0, %v1374_v1 }
 0x2c4   :  { %1188 = vmatprep.subr.bf16.mxu1 %v1374_v1 }
 0x2ca   :  { %1185 = vmatmul.mubr.msk.bf16.vlgmr.msra.gmra.mrb[20].mxu1 %vm614_vm2, %v726_v21 }
 0x2cb   :  { %1189 = vmatpush3.bf16.msra.mxu1 %v1615_v20  ;;  %1190 = vmatprep.mubr.msk.bf16.mxu1 %vm1375_vm0, %v1374_v1  ;;  %v1269_v20 = vld [vmem:[%s1688_s3 + $0x10] sm:$0xff]  }
 0x2cc   :  { %1199 = vmatpush3.bf16.msra.mxu0 %v1269_v20 }
 0x2cd   :  { %1200 = vmatprep.subr.bf16.mxu0 %v1374_v1 }
 0x2d0   :  { %1201 = vmatpush3.bf16.msra.mxu0 %v1270_v25 }
 0x2d1   :  { %1202 = vmatprep.subr.bf16.mxu0 %v1374_v1 }
 0x2d2   :  { %1191 = vmatmul.mubr.msk.bf16.vlgmr.msra.gmra.mrb[24].mxu1 %vm614_vm2, %v781_v22 }
 0x2d4   :  { %1203 = vmatpush3.bf16.msra.mxu0 %v1271_v26 }
 0x2d5   :  { %1204 = vmatprep.subr.bf16.mxu0 %v1374_v1 }
 0x2d8   :  { %1205 = vmatpush3.bf16.msra.mxu0 %v1272_v27 }
 0x2d9   :  { %1206 = vmatprep.subr.bf16.mxu0 %v1374_v1 }
 0x2dc   :  { %1207 = vmatpush3.bf16.msra.mxu0 %v1273_v28 }
 0x2dd   :  { %1208 = vmatprep.subr.bf16.mxu0 %v1374_v1 }
 0x2e0   :  { %1209 = vmatpush3.bf16.msra.mxu0 %v1274_v29 }
 0x38d   :  { %v656_v30 = vpop.f32.mrb[12].mxu1 }
 0x38e   :  { %v1174_v31 = vpop.f32.mrb[13].mxu1  ;;  %v663_v36 = vmul.f32 %v656_v30, %v1576_v5 }
 0x38f   :  { %v659_v32 = vpop.f32.mrb[14].mxu1 }
 0x390   :  { %v1175_v33 = vpop.f32.mrb[15].mxu1  ;;  %v664_v41 = vmul.f32 %v659_v32, %v1580_v8 }
 0x395   :  { %v709_v35 = vpop.f32.mrb[16].mxu1 }
 0x396   :  { %v716_v37 = vmul.f32 %v709_v35, %v666_v34  ;;  %v1180_v38 = vpop.f32.mrb[17].mxu1 }
 0x397   :  { %v712_v40 = vpop.f32.mrb[18].mxu1 }
 0x398   :  { %v718_v1 = vadd.f32 %v716_v37, %v663_v36  ;;  %v717_v42 = vmul.f32 %v712_v40, %v668_v39  ;;  %v1181_v43 = vpop.f32.mrb[19].mxu1 }
 0x39a   :  { %v719_v44 = vadd.f32 %v717_v42, %v664_v41 }
 0x39d   :  { %v764_v46 = vpop.f32.mrb[20].mxu1 }
 0x39e   :  { %v771_v47 = vmul.f32 %v764_v46, %v721_v45  ;;  %v1186_v48 = vpop.f32.mrb[21].mxu1 }
 0x39f   :  { %v767_v50 = vpop.f32.mrb[22].mxu1 }
 0x3a0   :  { %v773_v51 = vadd.f32 %v771_v47, %v718_v1  ;;  %v772_v52 = vmul.f32 %v767_v50, %v723_v49  ;;  %v1187_v53 = vpop.f32.mrb[23].mxu1 }
 0x3a2   :  { %v774_v5 = vadd.f32 %v772_v52, %v719_v44 }
 0x3a5   :  { %v819_v55 = vpop.f32.mrb[24].mxu1 }
 0x3a6   :  { %v826_v56 = vmul.f32 %v819_v55, %v776_v54  ;;  %v1192_v57 = vpop.f32.mrb[25].mxu1 }
 0x3a7   :  { %v822_v8 = vpop.f32.mrb[26].mxu1 }
 0x3a8   :  { %v828_v59 = vadd.f32 %v826_v56, %v773_v51  ;;  %v827_v60 = vmul.f32 %v822_v8, %v778_v58  ;;  %v1193_v61 = vpop.f32.mrb[27].mxu1 }
 0x3aa   :  { %v829_v62 = vadd.f32 %v827_v60, %v774_v5 }
 0x3ac   :  { %v830_v63 = vpack.c.bf16 %v829_v62, %v828_v59 }
 0x3ae   :  { %1211 = vmatmul.mubr.bf16.vlgmr.msra.gmra.mrb[12].mxu0 %v830_v63 }
 0x481   :  { %v936_v2 = vpop.f32.mrb[12].mxu0 }
 0x482   :  { %v937_v3 = vadd.f32 %v999_v0, %v936_v2  ;;  %v1212_v4 = vpop.f32.mrb[13].mxu0 }
 0x483   :  { %v939_v6 = vpop.f32.mrb[14].mxu0 }
 0x484   :  { %943 = vst [vmem:[#allocation7] sm:$0xff] %v937_v3  ;;  %v940_v7 = vadd.f32 %v999_v0, %v939_v6  ;;  %v1213_v9 = vpop.f32.mrb[15].mxu0 }
 0x486   :  { %944 = vst [vmem:[#allocation7 + $0x8] sm:$0xff] %v940_v7 }
 0x487   :  { %1350 = shalt.err (!%p1347_p6)
}
 0x488   :  { %s1351_s23 = scalar_lea.hbm %s1692_s7, 256 }
 0x489   :  { %p1352_p7 = scmp.ne.s32.totalorder %s1692_s7, %s1351_s23  ;;  %p1355_p8 = scmp.lt.u32.totalorder %s1351_s23, %s1692_s7 }
 0x48b   :  { %p1357_p9 = pnand %p1355_p8, %p1352_p7 }
 0x48d   :  { %1360 = shalt.err (!%p1357_p9)
}
 0x48e   :  { %956 = dma.vmem_to_hbm [thread:$0]  %s951_s21, 256, %s1692_s7, [#allocation4], %s1368_s11, %s1368_s11, %s1369_s12  }
 0x48f   :  { %1365 = dma.done.wait [#allocation4], 256  }
 0x490   :  { %1366 = vsyncadd [#allocation4], 4294967040 }
 0x491   :  { %960 = vsyncpa [#allocation3], 1 }
 0x492   :  { %961 = vsyncpa [#allocation6], 1 }
 0x493   :  { %962 = vsyncpa [#allocation4], 1 }

</bundles_post_ra>
